<compile_context>
chip_gen: v5e
topology: v5e:2x2
jax: 0.10.0
libtpu: 0.0.40
codegen_flags: <defaults>
</compile_context>

<pallas_src>
import functools
import numpy as np

import jax
import jax.numpy as jnp
from jax import lax
from jax.experimental import pallas as pl
from jax.experimental.pallas import tpu as pltpu


# ----------------------------- in-kernel helpers ------------------------------

def _layernorm(z, g, b, eps):
    """LayerNorm over last dim, PyTorch semantics (eps inside rsqrt). f32 math."""
    mu = jnp.mean(z, axis=-1, keepdims=True)
    d = z - mu
    var = jnp.mean(d * d, axis=-1, keepdims=True)
    return d * lax.rsqrt(var + eps) * g + b


def _mha_into(ctx_ref, q, k, v, bias, *, num_heads, scale):
    """Multi-head attention. q: (Sq, D) bf16, k/v: (Sk, D) bf16, bias: (Sq|1, Sk) f32.

    Writes the (Sq, D) f32 context into `ctx_ref`. Heads are processed in a static
    unrolled loop; each head's result is stored at a static lane offset into the
    VMEM scratch, so there is no lane-concatenate and the result read back for the
    output projection is a single lane-dense (Sq, D) slab. Softmax statistics f32.
    """
    D = q.shape[-1]
    dh = D // num_heads
    for h in range(num_heads):
        sl = slice(h * dh, (h + 1) * dh)
        # q . k^T via dot_general contracting the last dims (no explicit transpose).
        s = lax.dot_general(q[:, sl], k[:, sl], (((1,), (1,)), ((), ())),
                            preferred_element_type=jnp.float32) * scale
        s = s + bias
        s = s - jnp.max(s, axis=-1, keepdims=True)
        p = jnp.exp(s)
        inv = pl.reciprocal(jnp.sum(p, axis=-1, keepdims=True), approx=True)
        p = (p * inv).astype(jnp.bfloat16)
        ctx_ref[:, sl] = jnp.dot(p, v[:, sl], preferred_element_type=jnp.float32)


# ----------------------------- fused decoder-stack kernel ---------------------

def _decoder_stack_kernel(
    x_ref, enc_ref, pe_ref, la_ref, tp_ref, sp_ref,
    wqkv_ref, bqkv_ref, wo1_ref, bo1_ref,
    wq2_ref, bq2_ref, wkv2_ref, bkv2_ref, wo2_ref, bo2_ref,
    w1_ref, b1_ref, w2_ref, b2_ref,
    lng_ref, lnb_ref,
    out_ref,
    ctx_ref,
    *, num_heads, input_scale, eps):
    D = out_ref.shape[-1]
    dh = D // num_heads
    scale = 1.0 / float(np.sqrt(dh))
    l = pl.program_id(1)

    # Layer 0: fold input scaling (sqrt(d_model)) + positional encoding into the
    # resident output block, which then carries the activation across the layer axis.
    @pl.when(l == 0)
    def _():
        out_ref[0] = x_ref[0] * input_scale + pe_ref[...]

    x = out_ref[0]                                        # (Sq, D) f32 (resident)
    enc = enc_ref[0]                                      # (Sk, D) f32
    lng = lng_ref[0]                                      # (3, D) f32
    lnb = lnb_ref[0]                                      # (3, D) f32

    # Additive masks built in-kernel (mask value 1 => masked => -1e9), f32.
    self_bias = jnp.where(la_ref[...] + tp_ref[0] > 0.0, -1e9, 0.0)     # (Sq, Sq)
    cross_bias = jnp.where(sp_ref[0] > 0.0, -1e9, 0.0)                  # (1, Sk)

    # ---- masked self-attention + residual + LayerNorm ----
    qkv = (jnp.dot(x.astype(jnp.bfloat16), wqkv_ref[0],
                   preferred_element_type=jnp.float32) + bqkv_ref[0]
           ).astype(jnp.bfloat16)                                        # (Sq, 3D)
    _mha_into(ctx_ref, qkv[:, :D], qkv[:, D:2 * D], qkv[:, 2 * D:], self_bias,
              num_heads=num_heads, scale=scale)
    attn1 = jnp.dot(ctx_ref[...].astype(jnp.bfloat16), wo1_ref[0],
                    preferred_element_type=jnp.float32) + bo1_ref[0]
    out1 = _layernorm(attn1 + x, lng[0:1], lnb[0:1], eps)

    # ---- cross-attention (query = decoder, key/value = encoder) + residual + LN ----
    q2 = (jnp.dot(out1.astype(jnp.bfloat16), wq2_ref[0],
                  preferred_element_type=jnp.float32) + bq2_ref[0]
          ).astype(jnp.bfloat16)                                         # (Sq, D)
    kv2 = (jnp.dot(enc.astype(jnp.bfloat16), wkv2_ref[0],
                   preferred_element_type=jnp.float32) + bkv2_ref[0]
           ).astype(jnp.bfloat16)                                        # (Sk, 2D)
    _mha_into(ctx_ref, q2, kv2[:, :D], kv2[:, D:], cross_bias,
              num_heads=num_heads, scale=scale)
    attn2 = jnp.dot(ctx_ref[...].astype(jnp.bfloat16), wo2_ref[0],
                    preferred_element_type=jnp.float32) + bo2_ref[0]
    out2 = _layernorm(attn2 + out1, lng[1:2], lnb[1:2], eps)

    # ---- position-wise FFN (relu) + residual + LayerNorm ----
    hdn = jnp.dot(out2.astype(jnp.bfloat16), w1_ref[0],
                  preferred_element_type=jnp.float32) + b1_ref[0]
    hdn = jnp.maximum(hdn, 0.0).astype(jnp.bfloat16)
    ffn = jnp.dot(hdn, w2_ref[0], preferred_element_type=jnp.float32) + b2_ref[0]
    out_ref[0] = _layernorm(ffn + out2, lng[2:3], lnb[2:3], eps)


# ----------------------------- model glue -------------------------------------

def decoder_forward(word_input, encoder_output, look_ahead_mask,
                    source_padding_mask, target_padding_mask, params,
                    *, num_layers, d_model, num_heads):
    B, Sq = word_input.shape
    Sk = encoder_output.shape[1]
    D = d_model
    L = num_layers
    assert Sq <= params["pos_encoding"].shape[0], "sequence longer than max_seq_len=100"

    # Word-embedding gather stays in plain JAX (no clean tiny-Pallas gather needed).
    emb = jnp.take(params["embedding"], word_input, axis=0)     # (B, Sq, D) f32
    pe = params["pos_encoding"][:Sq]                            # (Sq, D)
    st = params["stack"]
    # TODO(synk): training-mode dropout(rate) not implemented; inference forward => identity.

    tp = target_padding_mask.reshape(B, 1, Sq)
    sp = source_padding_mask.reshape(B, 1, Sk)

    def per_batch(arr):    # indexed by batch grid axis, replicated over layer axis
        zeros = (0,) * (arr.ndim - 1)
        return pl.BlockSpec((1,) + arr.shape[1:], lambda b, l: (b,) + zeros)

    def per_layer(arr):    # stacked per-layer weights, indexed by layer grid axis
        zeros = (0,) * (arr.ndim - 1)
        return pl.BlockSpec((1,) + arr.shape[1:], lambda b, l: (l,) + zeros)

    def rep(arr):          # fully replicated
        zeros = (0,) * arr.ndim
        return pl.BlockSpec(arr.shape, lambda b, l: zeros)

    weight_order = ["wqkv", "bqkv", "wo1", "bo1", "wq2", "bq2", "wkv2", "bkv2",
                    "wo2", "bo2", "ffn_w1", "ffn_b1", "ffn_w2", "ffn_b2",
                    "ln_g", "ln_b"]
    weights = [st[k] for k in weight_order]

    in_specs = ([per_batch(emb), per_batch(encoder_output), rep(pe),
                 rep(look_ahead_mask), per_batch(tp), per_batch(sp)]
                + [per_layer(w) for w in weights])

    return pl.pallas_call(
        functools.partial(_decoder_stack_kernel, num_heads=num_heads,
                          input_scale=float(np.sqrt(d_model)), eps=1e-5),
        out_shape=jax.ShapeDtypeStruct((B, Sq, D), jnp.float32),
        grid=(B, L),
        in_specs=in_specs,
        out_specs=pl.BlockSpec((1, Sq, D), lambda b, l: (b, 0, 0)),
        scratch_shapes=[pltpu.VMEM((Sq, D), jnp.float32)],   # MHA context scratch
        compiler_params=pltpu.CompilerParams(
            dimension_semantics=("parallel", "arbitrary"),
            vmem_limit_bytes=64 * 1024 * 1024),
    )(emb, encoder_output, pe, look_ahead_mask, tp, sp, *weights)


# ----------------------------- parameter init ---------------------------------

def sinusoidal_pos_encoding(max_len, d_model):
    pos = np.arange(max_len)[:, None].astype(np.float32)
    i = np.arange(d_model)[None, :].astype(np.float32)
    angle = pos / np.power(10000.0, (2.0 * (i // 2)) / d_model)
    pe = np.zeros((max_len, d_model), dtype=np.float32)
    pe[:, 0::2] = np.sin(angle[:, 0::2])
    pe[:, 1::2] = np.cos(angle[:, 1::2])
    return jnp.asarray(pe)


def init_params(key, vocab, d_model, num_heads, num_layers, dff):
    """Per-layer weights are stacked along a leading (num_layers,) axis so the
    whole decoder runs as a single pallas_call with a layer grid axis."""
    def dense(k, fan_in, fan_out):
        w = (0.02 * jax.random.normal(k, (num_layers, fan_in, fan_out),
                                      jnp.float32)).astype(jnp.bfloat16)
        b = jnp.zeros((num_layers, 1, fan_out), jnp.float32)
        return w, b

    key, ke, k1, k2, k3, k4, k5, k6, k7 = jax.random.split(key, 9)
    stack = {}
    stack["wqkv"], stack["bqkv"] = dense(k1, d_model, 3 * d_model)    # fused Q/K/V (self)
    stack["wo1"], stack["bo1"] = dense(k2, d_model, d_model)
    stack["wq2"], stack["bq2"] = dense(k3, d_model, d_model)          # cross-attn query
    stack["wkv2"], stack["bkv2"] = dense(k4, d_model, 2 * d_model)    # fused K/V (cross)
    stack["wo2"], stack["bo2"] = dense(k5, d_model, d_model)
    stack["ffn_w1"], stack["ffn_b1"] = dense(k6, d_model, dff)
    stack["ffn_w2"], stack["ffn_b2"] = dense(k7, dff, d_model)
    stack["ln_g"] = jnp.ones((num_layers, 3, d_model), jnp.float32)   # LN1/LN2/LN3 gains
    stack["ln_b"] = jnp.zeros((num_layers, 3, d_model), jnp.float32)  # LN1/LN2/LN3 biases

    return {
        "embedding": jax.random.normal(ke, (vocab, d_model), jnp.float32),
        "pos_encoding": sinusoidal_pos_encoding(100, d_model),
        "stack": stack,
    }


# ----------------------------------- main --------------------------------------

if __name__ == "__main__":
    B, Sq, Sk = 2, 8, 8
    d_model, num_heads, num_layers, dff, vocab = 32, 4, 2, 64, 50

    key = jax.random.PRNGKey(0)
    key, k_tok, k_enc, k_par = jax.random.split(key, 4)

    word_input = jax.random.randint(k_tok, (B, Sq), 0, vocab, dtype=jnp.int32)
    encoder_output = jax.random.normal(k_enc, (B, Sk, d_model), jnp.float32)
    look_ahead_mask = jnp.triu(jnp.ones((Sq, Sq), jnp.float32), k=1)   # 1 = masked (future)
    target_padding_mask = jnp.zeros((B, Sq), jnp.float32)              # 1 = pad position
    source_padding_mask = jnp.zeros((B, Sk), jnp.float32)

    params = init_params(k_par, vocab, d_model, num_heads, num_layers, dff)

    fwd = jax.jit(functools.partial(decoder_forward, num_layers=num_layers,
                                    d_model=d_model, num_heads=num_heads))
    out = fwd(word_input, encoder_output, look_ahead_mask,
              source_padding_mask, target_padding_mask, params)
    out = jax.block_until_ready(out)

    assert out.shape == (B, Sq, d_model), out.shape
    assert bool(jnp.all(jnp.isfinite(out))), "non-finite output"
    print("KERNEL_OK")
</pallas_src>

<mosaic_0001>
module attributes {stable_mosaic.version = 11 : i64} {
  func.func @_decoder_stack_kernel(%arg0: i32, %arg1: i32, %arg2: memref<1x8x32xf32, #tpu.memory_space<vmem>>, %arg3: memref<1x8x32xf32, #tpu.memory_space<vmem>>, %arg4: memref<8x32xf32, #tpu.memory_space<vmem>>, %arg5: memref<8x8xf32, #tpu.memory_space<vmem>>, %arg6: memref<1x1x8xf32, #tpu.memory_space<vmem>>, %arg7: memref<1x1x8xf32, #tpu.memory_space<vmem>>, %arg8: memref<1x32x96xbf16, #tpu.memory_space<vmem>>, %arg9: memref<1x1x96xf32, #tpu.memory_space<vmem>>, %arg10: memref<1x32x32xbf16, #tpu.memory_space<vmem>>, %arg11: memref<1x1x32xf32, #tpu.memory_space<vmem>>, %arg12: memref<1x32x32xbf16, #tpu.memory_space<vmem>>, %arg13: memref<1x1x32xf32, #tpu.memory_space<vmem>>, %arg14: memref<1x32x64xbf16, #tpu.memory_space<vmem>>, %arg15: memref<1x1x64xf32, #tpu.memory_space<vmem>>, %arg16: memref<1x32x32xbf16, #tpu.memory_space<vmem>>, %arg17: memref<1x1x32xf32, #tpu.memory_space<vmem>>, %arg18: memref<1x32x64xbf16, #tpu.memory_space<vmem>>, %arg19: memref<1x1x64xf32, #tpu.memory_space<vmem>>, %arg20: memref<1x64x32xbf16, #tpu.memory_space<vmem>>, %arg21: memref<1x1x32xf32, #tpu.memory_space<vmem>>, %arg22: memref<1x3x32xf32, #tpu.memory_space<vmem>>, %arg23: memref<1x3x32xf32, #tpu.memory_space<vmem>>, %arg24: memref<1x8x32xf32, #tpu.memory_space<vmem>>, %arg25: memref<8x32xf32, #tpu.memory_space<vmem>>) attributes {dimension_semantics = [#tpu.dimension_semantics<parallel>, #tpu.dimension_semantics<arbitrary>], iteration_bounds = array<i64: 2, 2>, scalar_prefetch = 0 : i64, scratch_operands = 1 : i64, tpu.core_type = #tpu.core_type<tc>, window_params = [{transform_indices = @transform_0, window_bounds = array<i64: 1, 8, 32>}, {transform_indices = @transform_1, window_bounds = array<i64: 1, 8, 32>}, {pipeline_mode = #tpu.pipeline_mode<synchronous>, transform_indices = @transform_2, window_bounds = array<i64: 8, 32>}, {pipeline_mode = #tpu.pipeline_mode<synchronous>, transform_indices = @transform_3, window_bounds = array<i64: 8, 8>}, {transform_indices = @transform_4, window_bounds = array<i64: 1, 1, 8>}, {transform_indices = @transform_5, window_bounds = array<i64: 1, 1, 8>}, {transform_indices = @transform_6, window_bounds = array<i64: 1, 32, 96>}, {transform_indices = @transform_7, window_bounds = array<i64: 1, 1, 96>}, {transform_indices = @transform_8, window_bounds = array<i64: 1, 32, 32>}, {transform_indices = @transform_9, window_bounds = array<i64: 1, 1, 32>}, {transform_indices = @transform_10, window_bounds = array<i64: 1, 32, 32>}, {transform_indices = @transform_11, window_bounds = array<i64: 1, 1, 32>}, {transform_indices = @transform_12, window_bounds = array<i64: 1, 32, 64>}, {transform_indices = @transform_13, window_bounds = array<i64: 1, 1, 64>}, {transform_indices = @transform_14, window_bounds = array<i64: 1, 32, 32>}, {transform_indices = @transform_15, window_bounds = array<i64: 1, 1, 32>}, {transform_indices = @transform_16, window_bounds = array<i64: 1, 32, 64>}, {transform_indices = @transform_17, window_bounds = array<i64: 1, 1, 64>}, {transform_indices = @transform_18, window_bounds = array<i64: 1, 64, 32>}, {transform_indices = @transform_19, window_bounds = array<i64: 1, 1, 32>}, {transform_indices = @transform_20, window_bounds = array<i64: 1, 3, 32>}, {transform_indices = @transform_21, window_bounds = array<i64: 1, 3, 32>}, {transform_indices = @transform_22, window_bounds = array<i64: 1, 8, 32>}]} {
    %c0_i32 = arith.constant 0 : i32
    %0 = arith.cmpi eq, %arg1, %c0_i32 : i32
    %1 = arith.extui %0 : i1 to i32
    %c0_i32_0 = arith.constant 0 : i32
    %2 = arith.cmpi ne, %1, %c0_i32_0 : i32
    scf.if %2 {
      %c0_150 = arith.constant 0 : index
      %c0_151 = arith.constant 0 : index
      %c0_152 = arith.constant 0 : index
      %332 = vector.load %arg2[%c0_150, %c0_151, %c0_152] : memref<1x8x32xf32, #tpu.memory_space<vmem>>, vector<1x8x32xf32>
      %333 = vector.shape_cast %332 : vector<1x8x32xf32> to vector<8x32xf32>
      %cst_153 = arith.constant 5.65685415 : f32
      %334 = vector.broadcast %cst_153 : f32 to vector<8x32xf32>
      %335 = arith.mulf %333, %334 : vector<8x32xf32>
      %c0_154 = arith.constant 0 : index
      %c0_155 = arith.constant 0 : index
      %336 = vector.load %arg4[%c0_154, %c0_155] : memref<8x32xf32, #tpu.memory_space<vmem>>, vector<8x32xf32>
      %337 = arith.addf %335, %336 : vector<8x32xf32>
      %c0_156 = arith.constant 0 : index
      %c0_157 = arith.constant 0 : index
      %c0_158 = arith.constant 0 : index
      %338 = vector.load %arg24[%c0_156, %c0_157, %c0_158] : memref<1x8x32xf32, #tpu.memory_space<vmem>>, vector<1x8x32xf32>
      %339 = vector.shape_cast %338 : vector<1x8x32xf32> to vector<8x32xf32>
      %340 = vector.shape_cast %337 : vector<8x32xf32> to vector<1x8x32xf32>
      tpu.vector_store %arg24[%c0_156, %c0_157, %c0_158], %340 {strides = array<i32>} : memref<1x8x32xf32, #tpu.memory_space<vmem>>, vector<1x8x32xf32>,
    } else {
    }
    %c0 = arith.constant 0 : index
    %c0_1 = arith.constant 0 : index
    %c0_2 = arith.constant 0 : index
    %3 = vector.load %arg24[%c0, %c0_1, %c0_2] : memref<1x8x32xf32, #tpu.memory_space<vmem>>, vector<1x8x32xf32>
    %4 = vector.shape_cast %3 : vector<1x8x32xf32> to vector<8x32xf32>
    %c0_3 = arith.constant 0 : index
    %c0_4 = arith.constant 0 : index
    %c0_5 = arith.constant 0 : index
    %5 = vector.load %arg3[%c0_3, %c0_4, %c0_5] : memref<1x8x32xf32, #tpu.memory_space<vmem>>, vector<1x8x32xf32>
    %6 = vector.shape_cast %5 : vector<1x8x32xf32> to vector<8x32xf32>
    %c0_6 = arith.constant 0 : index
    %c0_7 = arith.constant 0 : index
    %c0_8 = arith.constant 0 : index
    %7 = vector.load %arg22[%c0_6, %c0_7, %c0_8] : memref<1x3x32xf32, #tpu.memory_space<vmem>>, vector<1x3x32xf32>
    %8 = vector.shape_cast %7 : vector<1x3x32xf32> to vector<3x32xf32>
    %c0_9 = arith.constant 0 : index
    %c0_10 = arith.constant 0 : index
    %c0_11 = arith.constant 0 : index
    %9 = vector.load %arg23[%c0_9, %c0_10, %c0_11] : memref<1x3x32xf32, #tpu.memory_space<vmem>>, vector<1x3x32xf32>
    %10 = vector.shape_cast %9 : vector<1x3x32xf32> to vector<3x32xf32>
    %c0_12 = arith.constant 0 : index
    %c0_13 = arith.constant 0 : index
    %11 = vector.load %arg5[%c0_12, %c0_13] : memref<8x8xf32, #tpu.memory_space<vmem>>, vector<8x8xf32>
    %c0_14 = arith.constant 0 : index
    %c0_15 = arith.constant 0 : index
    %c0_16 = arith.constant 0 : index
    %12 = vector.load %arg6[%c0_14, %c0_15, %c0_16] : memref<1x1x8xf32, #tpu.memory_space<vmem>>, vector<1x1x8xf32>
    %13 = vector.shape_cast %12 : vector<1x1x8xf32> to vector<1x8xf32>
    %14 = vector.broadcast %13 : vector<1x8xf32> to vector<8x8xf32>
    %15 = arith.addf %11, %14 : vector<8x8xf32>
    %cst = arith.constant 0.000000e+00 : f32
    %16 = vector.broadcast %cst : f32 to vector<8x8xf32>
    %17 = arith.cmpf ogt, %15, %16 : vector<8x8xf32>
    %cst_17 = arith.constant -1.000000e+09 : f32
    %cst_18 = arith.constant 0.000000e+00 : f32
    %18 = vector.broadcast %cst_17 : f32 to vector<8x8xf32>
    %19 = vector.broadcast %cst_18 : f32 to vector<8x8xf32>
    %20 = arith.select %17, %18, %19 : vector<8x8xi1>, vector<8x8xf32>
    %c0_19 = arith.constant 0 : index
    %c0_20 = arith.constant 0 : index
    %c0_21 = arith.constant 0 : index
    %21 = vector.load %arg7[%c0_19, %c0_20, %c0_21] : memref<1x1x8xf32, #tpu.memory_space<vmem>>, vector<1x1x8xf32>
    %22 = vector.shape_cast %21 : vector<1x1x8xf32> to vector<1x8xf32>
    %cst_22 = arith.constant 0.000000e+00 : f32
    %23 = vector.broadcast %cst_22 : f32 to vector<1x8xf32>
    %24 = arith.cmpf ogt, %22, %23 : vector<1x8xf32>
    %cst_23 = arith.constant -1.000000e+09 : f32
    %cst_24 = arith.constant 0.000000e+00 : f32
    %25 = vector.broadcast %cst_23 : f32 to vector<1x8xf32>
    %26 = vector.broadcast %cst_24 : f32 to vector<1x8xf32>
    %27 = arith.select %24, %25, %26 : vector<1x8xi1>, vector<1x8xf32>
    %28 = arith.truncf %4 : vector<8x32xf32> to vector<8x32xbf16>
    %c0_25 = arith.constant 0 : index
    %c0_26 = arith.constant 0 : index
    %c0_27 = arith.constant 0 : index
    %29 = vector.load %arg8[%c0_25, %c0_26, %c0_27] : memref<1x32x96xbf16, #tpu.memory_space<vmem>>, vector<1x32x96xbf16>
    %30 = vector.shape_cast %29 : vector<1x32x96xbf16> to vector<32x96xbf16>
    %cst_28 = arith.constant dense<0.000000e+00> : vector<8x96xf32>
    %31 = tpu.matmul %28, %30, %cst_28 {dimension_numbers = #tpu.dot_dimension_numbers<[1], [0], [0], [1], [0, 0, 1, 1], [], []>} : vector<8x32xbf16>, vector<32x96xbf16>, vector<8x96xf32> -> vector<8x96xf32>
    %c0_29 = arith.constant 0 : index
    %c0_30 = arith.constant 0 : index
    %c0_31 = arith.constant 0 : index
    %32 = vector.load %arg9[%c0_29, %c0_30, %c0_31] : memref<1x1x96xf32, #tpu.memory_space<vmem>>, vector<1x1x96xf32>
    %33 = vector.shape_cast %32 : vector<1x1x96xf32> to vector<1x96xf32>
    %34 = vector.broadcast %33 : vector<1x96xf32> to vector<8x96xf32>
    %35 = arith.addf %31, %34 : vector<8x96xf32>
    %36 = arith.truncf %35 : vector<8x96xf32> to vector<8x96xbf16>
    %37 = vector.extract_strided_slice %36 {offsets = [0, 0], sizes = [8, 32], strides = [1, 1]} : vector<8x96xbf16> to vector<8x32xbf16>
    %38 = vector.extract_strided_slice %36 {offsets = [0, 32], sizes = [8, 32], strides = [1, 1]} : vector<8x96xbf16> to vector<8x32xbf16>
    %39 = vector.extract_strided_slice %36 {offsets = [0, 64], sizes = [8, 32], strides = [1, 1]} : vector<8x96xbf16> to vector<8x32xbf16>
    %40 = vector.extract_strided_slice %37 {offsets = [0, 0], sizes = [8, 8], strides = [1, 1]} : vector<8x32xbf16> to vector<8x8xbf16>
    %41 = vector.extract_strided_slice %38 {offsets = [0, 0], sizes = [8, 8], strides = [1, 1]} : vector<8x32xbf16> to vector<8x8xbf16>
    %cst_32 = arith.constant dense<0.000000e+00> : vector<8x8xf32>
    %42 = tpu.matmul %40, %41, %cst_32 {dimension_numbers = #tpu.dot_dimension_numbers<[1], [1], [0], [0], [0, 0, 1, 0], [], []>} : vector<8x8xbf16>, vector<8x8xbf16>, vector<8x8xf32> -> vector<8x8xf32>
    %cst_33 = arith.constant 0.353553385 : f32
    %43 = vector.broadcast %cst_33 : f32 to vector<8x8xf32>
    %44 = arith.mulf %42, %43 : vector<8x8xf32>
    %45 = arith.addf %44, %20 : vector<8x8xf32>
    %cst_34 = arith.constant dense<0xFF800000> : vector<8xf32>
    %46 = vector.multi_reduction <maximumf>, %45, %cst_34 [1] : vector<8x8xf32> to vector<8xf32>
    %47 = vector.shape_cast %46 : vector<8xf32> to vector<8x1xf32>
    %48 = vector.broadcast %47 : vector<8x1xf32> to vector<8x8xf32>
    %49 = arith.subf %45, %48 : vector<8x8xf32>
    %50 = math.exp %49 : vector<8x8xf32>
    %cst_35 = arith.constant dense<0.000000e+00> : vector<8xf32>
    %51 = vector.multi_reduction <add>, %50, %cst_35 [1] : vector<8x8xf32> to vector<8xf32>
    %52 = vector.shape_cast %51 : vector<8xf32> to vector<8x1xf32>
    %53 = tpu.reciprocal %52 {approx = true} : vector<8x1xf32> -> vector<8x1xf32>
    %54 = vector.broadcast %53 : vector<8x1xf32> to vector<8x8xf32>
    %55 = arith.mulf %50, %54 : vector<8x8xf32>
    %56 = arith.truncf %55 : vector<8x8xf32> to vector<8x8xbf16>
    %57 = vector.extract_strided_slice %39 {offsets = [0, 0], sizes = [8, 8], strides = [1, 1]} : vector<8x32xbf16> to vector<8x8xbf16>
    %cst_36 = arith.constant dense<0.000000e+00> : vector<8x8xf32>
    %58 = tpu.matmul %56, %57, %cst_36 {dimension_numbers = #tpu.dot_dimension_numbers<[1], [0], [0], [1], [0, 0, 1, 1], [], []>} : vector<8x8xbf16>, vector<8x8xbf16>, vector<8x8xf32> -> vector<8x8xf32>
    %c0_37 = arith.constant 0 : index
    %c0_38 = arith.constant 0 : index
    %59 = vector.load %arg25[%c0_37, %c0_38] : memref<8x32xf32, #tpu.memory_space<vmem>>, vector<8x8xf32>
    tpu.vector_store %arg25[%c0_37, %c0_38], %58 {strides = array<i32>} : memref<8x32xf32, #tpu.memory_space<vmem>>, vector<8x8xf32>,
    %60 = vector.extract_strided_slice %37 {offsets = [0, 8], sizes = [8, 8], strides = [1, 1]} : vector<8x32xbf16> to vector<8x8xbf16>
    %61 = vector.extract_strided_slice %38 {offsets = [0, 8], sizes = [8, 8], strides = [1, 1]} : vector<8x32xbf16> to vector<8x8xbf16>
    %cst_39 = arith.constant dense<0.000000e+00> : vector<8x8xf32>
    %62 = tpu.matmul %60, %61, %cst_39 {dimension_numbers = #tpu.dot_dimension_numbers<[1], [1], [0], [0], [0, 0, 1, 0], [], []>} : vector<8x8xbf16>, vector<8x8xbf16>, vector<8x8xf32> -> vector<8x8xf32>
    %cst_40 = arith.constant 0.353553385 : f32
    %63 = vector.broadcast %cst_40 : f32 to vector<8x8xf32>
    %64 = arith.mulf %62, %63 : vector<8x8xf32>
    %65 = arith.addf %64, %20 : vector<8x8xf32>
    %cst_41 = arith.constant dense<0xFF800000> : vector<8xf32>
    %66 = vector.multi_reduction <maximumf>, %65, %cst_41 [1] : vector<8x8xf32> to vector<8xf32>
    %67 = vector.shape_cast %66 : vector<8xf32> to vector<8x1xf32>
    %68 = vector.broadcast %67 : vector<8x1xf32> to vector<8x8xf32>
    %69 = arith.subf %65, %68 : vector<8x8xf32>
    %70 = math.exp %69 : vector<8x8xf32>
    %cst_42 = arith.constant dense<0.000000e+00> : vector<8xf32>
    %71 = vector.multi_reduction <add>, %70, %cst_42 [1] : vector<8x8xf32> to vector<8xf32>
    %72 = vector.shape_cast %71 : vector<8xf32> to vector<8x1xf32>
    %73 = tpu.reciprocal %72 {approx = true} : vector<8x1xf32> -> vector<8x1xf32>
    %74 = vector.broadcast %73 : vector<8x1xf32> to vector<8x8xf32>
    %75 = arith.mulf %70, %74 : vector<8x8xf32>
    %76 = arith.truncf %75 : vector<8x8xf32> to vector<8x8xbf16>
    %77 = vector.extract_strided_slice %39 {offsets = [0, 8], sizes = [8, 8], strides = [1, 1]} : vector<8x32xbf16> to vector<8x8xbf16>
    %cst_43 = arith.constant dense<0.000000e+00> : vector<8x8xf32>
    %78 = tpu.matmul %76, %77, %cst_43 {dimension_numbers = #tpu.dot_dimension_numbers<[1], [0], [0], [1], [0, 0, 1, 1], [], []>} : vector<8x8xbf16>, vector<8x8xbf16>, vector<8x8xf32> -> vector<8x8xf32>
    %c0_44 = arith.constant 0 : index
    %c8 = arith.constant 8 : index
    %79 = vector.load %arg25[%c0_44, %c8] : memref<8x32xf32, #tpu.memory_space<vmem>>, vector<8x8xf32>
    tpu.vector_store %arg25[%c0_44, %c8], %78 {strides = array<i32>} : memref<8x32xf32, #tpu.memory_space<vmem>>, vector<8x8xf32>,
    %80 = vector.extract_strided_slice %37 {offsets = [0, 16], sizes = [8, 8], strides = [1, 1]} : vector<8x32xbf16> to vector<8x8xbf16>
    %81 = vector.extract_strided_slice %38 {offsets = [0, 16], sizes = [8, 8], strides = [1, 1]} : vector<8x32xbf16> to vector<8x8xbf16>
    %cst_45 = arith.constant dense<0.000000e+00> : vector<8x8xf32>
    %82 = tpu.matmul %80, %81, %cst_45 {dimension_numbers = #tpu.dot_dimension_numbers<[1], [1], [0], [0], [0, 0, 1, 0], [], []>} : vector<8x8xbf16>, vector<8x8xbf16>, vector<8x8xf32> -> vector<8x8xf32>
    %cst_46 = arith.constant 0.353553385 : f32
    %83 = vector.broadcast %cst_46 : f32 to vector<8x8xf32>
    %84 = arith.mulf %82, %83 : vector<8x8xf32>
    %85 = arith.addf %84, %20 : vector<8x8xf32>
    %cst_47 = arith.constant dense<0xFF800000> : vector<8xf32>
    %86 = vector.multi_reduction <maximumf>, %85, %cst_47 [1] : vector<8x8xf32> to vector<8xf32>
    %87 = vector.shape_cast %86 : vector<8xf32> to vector<8x1xf32>
    %88 = vector.broadcast %87 : vector<8x1xf32> to vector<8x8xf32>
    %89 = arith.subf %85, %88 : vector<8x8xf32>
    %90 = math.exp %89 : vector<8x8xf32>
    %cst_48 = arith.constant dense<0.000000e+00> : vector<8xf32>
    %91 = vector.multi_reduction <add>, %90, %cst_48 [1] : vector<8x8xf32> to vector<8xf32>
    %92 = vector.shape_cast %91 : vector<8xf32> to vector<8x1xf32>
    %93 = tpu.reciprocal %92 {approx = true} : vector<8x1xf32> -> vector<8x1xf32>
    %94 = vector.broadcast %93 : vector<8x1xf32> to vector<8x8xf32>
    %95 = arith.mulf %90, %94 : vector<8x8xf32>
    %96 = arith.truncf %95 : vector<8x8xf32> to vector<8x8xbf16>
    %97 = vector.extract_strided_slice %39 {offsets = [0, 16], sizes = [8, 8], strides = [1, 1]} : vector<8x32xbf16> to vector<8x8xbf16>
    %cst_49 = arith.constant dense<0.000000e+00> : vector<8x8xf32>
    %98 = tpu.matmul %96, %97, %cst_49 {dimension_numbers = #tpu.dot_dimension_numbers<[1], [0], [0], [1], [0, 0, 1, 1], [], []>} : vector<8x8xbf16>, vector<8x8xbf16>, vector<8x8xf32> -> vector<8x8xf32>
    %c0_50 = arith.constant 0 : index
    %c16 = arith.constant 16 : index
    %99 = vector.load %arg25[%c0_50, %c16] : memref<8x32xf32, #tpu.memory_space<vmem>>, vector<8x8xf32>
    tpu.vector_store %arg25[%c0_50, %c16], %98 {strides = array<i32>} : memref<8x32xf32, #tpu.memory_space<vmem>>, vector<8x8xf32>,
    %100 = vector.extract_strided_slice %37 {offsets = [0, 24], sizes = [8, 8], strides = [1, 1]} : vector<8x32xbf16> to vector<8x8xbf16>
    %101 = vector.extract_strided_slice %38 {offsets = [0, 24], sizes = [8, 8], strides = [1, 1]} : vector<8x32xbf16> to vector<8x8xbf16>
    %cst_51 = arith.constant dense<0.000000e+00> : vector<8x8xf32>
    %102 = tpu.matmul %100, %101, %cst_51 {dimension_numbers = #tpu.dot_dimension_numbers<[1], [1], [0], [0], [0, 0, 1, 0], [], []>} : vector<8x8xbf16>, vector<8x8xbf16>, vector<8x8xf32> -> vector<8x8xf32>
    %cst_52 = arith.constant 0.353553385 : f32
    %103 = vector.broadcast %cst_52 : f32 to vector<8x8xf32>
    %104 = arith.mulf %102, %103 : vector<8x8xf32>
    %105 = arith.addf %104, %20 : vector<8x8xf32>
    %cst_53 = arith.constant dense<0xFF800000> : vector<8xf32>
    %106 = vector.multi_reduction <maximumf>, %105, %cst_53 [1] : vector<8x8xf32> to vector<8xf32>
    %107 = vector.shape_cast %106 : vector<8xf32> to vector<8x1xf32>
    %108 = vector.broadcast %107 : vector<8x1xf32> to vector<8x8xf32>
    %109 = arith.subf %105, %108 : vector<8x8xf32>
    %110 = math.exp %109 : vector<8x8xf32>
    %cst_54 = arith.constant dense<0.000000e+00> : vector<8xf32>
    %111 = vector.multi_reduction <add>, %110, %cst_54 [1] : vector<8x8xf32> to vector<8xf32>
    %112 = vector.shape_cast %111 : vector<8xf32> to vector<8x1xf32>
    %113 = tpu.reciprocal %112 {approx = true} : vector<8x1xf32> -> vector<8x1xf32>
    %114 = vector.broadcast %113 : vector<8x1xf32> to vector<8x8xf32>
    %115 = arith.mulf %110, %114 : vector<8x8xf32>
    %116 = arith.truncf %115 : vector<8x8xf32> to vector<8x8xbf16>
    %117 = vector.extract_strided_slice %39 {offsets = [0, 24], sizes = [8, 8], strides = [1, 1]} : vector<8x32xbf16> to vector<8x8xbf16>
    %cst_55 = arith.constant dense<0.000000e+00> : vector<8x8xf32>
    %118 = tpu.matmul %116, %117, %cst_55 {dimension_numbers = #tpu.dot_dimension_numbers<[1], [0], [0], [1], [0, 0, 1, 1], [], []>} : vector<8x8xbf16>, vector<8x8xbf16>, vector<8x8xf32> -> vector<8x8xf32>
    %c0_56 = arith.constant 0 : index
    %c24 = arith.constant 24 : index
    %119 = vector.load %arg25[%c0_56, %c24] : memref<8x32xf32, #tpu.memory_space<vmem>>, vector<8x8xf32>
    tpu.vector_store %arg25[%c0_56, %c24], %118 {strides = array<i32>} : memref<8x32xf32, #tpu.memory_space<vmem>>, vector<8x8xf32>,
    %c0_57 = arith.constant 0 : index
    %c0_58 = arith.constant 0 : index
    %120 = vector.load %arg25[%c0_57, %c0_58] : memref<8x32xf32, #tpu.memory_space<vmem>>, vector<8x32xf32>
    %121 = arith.truncf %120 : vector<8x32xf32> to vector<8x32xbf16>
    %c0_59 = arith.constant 0 : index
    %c0_60 = arith.constant 0 : index
    %c0_61 = arith.constant 0 : index
    %122 = vector.load %arg10[%c0_59, %c0_60, %c0_61] : memref<1x32x32xbf16, #tpu.memory_space<vmem>>, vector<1x32x32xbf16>
    %123 = vector.shape_cast %122 : vector<1x32x32xbf16> to vector<32x32xbf16>
    %cst_62 = arith.constant dense<0.000000e+00> : vector<8x32xf32>
    %124 = tpu.matmul %121, %123, %cst_62 {dimension_numbers = #tpu.dot_dimension_numbers<[1], [0], [0], [1], [0, 0, 1, 1], [], []>} : vector<8x32xbf16>, vector<32x32xbf16>, vector<8x32xf32> -> vector<8x32xf32>
    %c0_63 = arith.constant 0 : index
    %c0_64 = arith.constant 0 : index
    %c0_65 = arith.constant 0 : index
    %125 = vector.load %arg11[%c0_63, %c0_64, %c0_65] : memref<1x1x32xf32, #tpu.memory_space<vmem>>, vector<1x1x32xf32>
    %126 = vector.shape_cast %125 : vector<1x1x32xf32> to vector<1x32xf32>
    %127 = vector.broadcast %126 : vector<1x32xf32> to vector<8x32xf32>
    %128 = arith.addf %124, %127 : vector<8x32xf32>
    %129 = arith.addf %128, %4 : vector<8x32xf32>
    %130 = vector.extract_strided_slice %8 {offsets = [0, 0], sizes = [1, 32], strides = [1, 1]} : vector<3x32xf32> to vector<1x32xf32>
    %131 = vector.extract_strided_slice %10 {offsets = [0, 0], sizes = [1, 32], strides = [1, 1]} : vector<3x32xf32> to vector<1x32xf32>
    %cst_66 = arith.constant dense<0.000000e+00> : vector<8xf32>
    %132 = vector.multi_reduction <add>, %129, %cst_66 [1] : vector<8x32xf32> to vector<8xf32>
    %133 = vector.shape_cast %132 : vector<8xf32> to vector<8x1xf32>
    %cst_67 = arith.constant 3.200000e+01 : f32
    %134 = vector.broadcast %cst_67 : f32 to vector<8x1xf32>
    %135 = arith.divf %133, %134 : vector<8x1xf32>
    %136 = vector.broadcast %135 : vector<8x1xf32> to vector<8x32xf32>
    %137 = arith.subf %129, %136 : vector<8x32xf32>
    %138 = arith.mulf %137, %137 : vector<8x32xf32>
    %cst_68 = arith.constant dense<0.000000e+00> : vector<8xf32>
    %139 = vector.multi_reduction <add>, %138, %cst_68 [1] : vector<8x32xf32> to vector<8xf32>
    %140 = vector.shape_cast %139 : vector<8xf32> to vector<8x1xf32>
    %cst_69 = arith.constant 3.200000e+01 : f32
    %141 = vector.broadcast %cst_69 : f32 to vector<8x1xf32>
    %142 = arith.divf %140, %141 : vector<8x1xf32>
    %cst_70 = arith.constant 9.99999974E-6 : f32
    %143 = vector.broadcast %cst_70 : f32 to vector<8x1xf32>
    %144 = arith.addf %142, %143 : vector<8x1xf32>
    %145 = math.rsqrt %144 : vector<8x1xf32>
    %146 = vector.broadcast %145 : vector<8x1xf32> to vector<8x32xf32>
    %147 = arith.mulf %137, %146 : vector<8x32xf32>
    %148 = vector.broadcast %130 : vector<1x32xf32> to vector<8x32xf32>
    %149 = arith.mulf %147, %148 : vector<8x32xf32>
    %150 = vector.broadcast %131 : vector<1x32xf32> to vector<8x32xf32>
    %151 = arith.addf %149, %150 : vector<8x32xf32>
    %152 = arith.truncf %151 : vector<8x32xf32> to vector<8x32xbf16>
    %c0_71 = arith.constant 0 : index
    %c0_72 = arith.constant 0 : index
    %c0_73 = arith.constant 0 : index
    %153 = vector.load %arg12[%c0_71, %c0_72, %c0_73] : memref<1x32x32xbf16, #tpu.memory_space<vmem>>, vector<1x32x32xbf16>
    %154 = vector.shape_cast %153 : vector<1x32x32xbf16> to vector<32x32xbf16>
    %cst_74 = arith.constant dense<0.000000e+00> : vector<8x32xf32>
    %155 = tpu.matmul %152, %154, %cst_74 {dimension_numbers = #tpu.dot_dimension_numbers<[1], [0], [0], [1], [0, 0, 1, 1], [], []>} : vector<8x32xbf16>, vector<32x32xbf16>, vector<8x32xf32> -> vector<8x32xf32>
    %c0_75 = arith.constant 0 : index
    %c0_76 = arith.constant 0 : index
    %c0_77 = arith.constant 0 : index
    %156 = vector.load %arg13[%c0_75, %c0_76, %c0_77] : memref<1x1x32xf32, #tpu.memory_space<vmem>>, vector<1x1x32xf32>
    %157 = vector.shape_cast %156 : vector<1x1x32xf32> to vector<1x32xf32>
    %158 = vector.broadcast %157 : vector<1x32xf32> to vector<8x32xf32>
    %159 = arith.addf %155, %158 : vector<8x32xf32>
    %160 = arith.truncf %159 : vector<8x32xf32> to vector<8x32xbf16>
    %161 = arith.truncf %6 : vector<8x32xf32> to vector<8x32xbf16>
    %c0_78 = arith.constant 0 : index
    %c0_79 = arith.constant 0 : index
    %c0_80 = arith.constant 0 : index
    %162 = vector.load %arg14[%c0_78, %c0_79, %c0_80] : memref<1x32x64xbf16, #tpu.memory_space<vmem>>, vector<1x32x64xbf16>
    %163 = vector.shape_cast %162 : vector<1x32x64xbf16> to vector<32x64xbf16>
    %cst_81 = arith.constant dense<0.000000e+00> : vector<8x64xf32>
    %164 = tpu.matmul %161, %163, %cst_81 {dimension_numbers = #tpu.dot_dimension_numbers<[1], [0], [0], [1], [0, 0, 1, 1], [], []>} : vector<8x32xbf16>, vector<32x64xbf16>, vector<8x64xf32> -> vector<8x64xf32>
    %c0_82 = arith.constant 0 : index
    %c0_83 = arith.constant 0 : index
    %c0_84 = arith.constant 0 : index
    %165 = vector.load %arg15[%c0_82, %c0_83, %c0_84] : memref<1x1x64xf32, #tpu.memory_space<vmem>>, vector<1x1x64xf32>
    %166 = vector.shape_cast %165 : vector<1x1x64xf32> to vector<1x64xf32>
    %167 = vector.broadcast %166 : vector<1x64xf32> to vector<8x64xf32>
    %168 = arith.addf %164, %167 : vector<8x64xf32>
    %169 = arith.truncf %168 : vector<8x64xf32> to vector<8x64xbf16>
    %170 = vector.extract_strided_slice %169 {offsets = [0, 0], sizes = [8, 32], strides = [1, 1]} : vector<8x64xbf16> to vector<8x32xbf16>
    %171 = vector.extract_strided_slice %169 {offsets = [0, 32], sizes = [8, 32], strides = [1, 1]} : vector<8x64xbf16> to vector<8x32xbf16>
    %172 = vector.extract_strided_slice %160 {offsets = [0, 0], sizes = [8, 8], strides = [1, 1]} : vector<8x32xbf16> to vector<8x8xbf16>
    %173 = vector.extract_strided_slice %170 {offsets = [0, 0], sizes = [8, 8], strides = [1, 1]} : vector<8x32xbf16> to vector<8x8xbf16>
    %cst_85 = arith.constant dense<0.000000e+00> : vector<8x8xf32>
    %174 = tpu.matmul %172, %173, %cst_85 {dimension_numbers = #tpu.dot_dimension_numbers<[1], [1], [0], [0], [0, 0, 1, 0], [], []>} : vector<8x8xbf16>, vector<8x8xbf16>, vector<8x8xf32> -> vector<8x8xf32>
    %cst_86 = arith.constant 0.353553385 : f32
    %175 = vector.broadcast %cst_86 : f32 to vector<8x8xf32>
    %176 = arith.mulf %174, %175 : vector<8x8xf32>
    %177 = vector.broadcast %27 : vector<1x8xf32> to vector<8x8xf32>
    %178 = arith.addf %176, %177 : vector<8x8xf32>
    %cst_87 = arith.constant dense<0xFF800000> : vector<8xf32>
    %179 = vector.multi_reduction <maximumf>, %178, %cst_87 [1] : vector<8x8xf32> to vector<8xf32>
    %180 = vector.shape_cast %179 : vector<8xf32> to vector<8x1xf32>
    %181 = vector.broadcast %180 : vector<8x1xf32> to vector<8x8xf32>
    %182 = arith.subf %178, %181 : vector<8x8xf32>
    %183 = math.exp %182 : vector<8x8xf32>
    %cst_88 = arith.constant dense<0.000000e+00> : vector<8xf32>
    %184 = vector.multi_reduction <add>, %183, %cst_88 [1] : vector<8x8xf32> to vector<8xf32>
    %185 = vector.shape_cast %184 : vector<8xf32> to vector<8x1xf32>
    %186 = tpu.reciprocal %185 {approx = true} : vector<8x1xf32> -> vector<8x1xf32>
    %187 = vector.broadcast %186 : vector<8x1xf32> to vector<8x8xf32>
    %188 = arith.mulf %183, %187 : vector<8x8xf32>
    %189 = arith.truncf %188 : vector<8x8xf32> to vector<8x8xbf16>
    %190 = vector.extract_strided_slice %171 {offsets = [0, 0], sizes = [8, 8], strides = [1, 1]} : vector<8x32xbf16> to vector<8x8xbf16>
    %cst_89 = arith.constant dense<0.000000e+00> : vector<8x8xf32>
    %191 = tpu.matmul %189, %190, %cst_89 {dimension_numbers = #tpu.dot_dimension_numbers<[1], [0], [0], [1], [0, 0, 1, 1], [], []>} : vector<8x8xbf16>, vector<8x8xbf16>, vector<8x8xf32> -> vector<8x8xf32>
    %c0_90 = arith.constant 0 : index
    %c0_91 = arith.constant 0 : index
    %192 = vector.load %arg25[%c0_90, %c0_91] : memref<8x32xf32, #tpu.memory_space<vmem>>, vector<8x8xf32>
    tpu.vector_store %arg25[%c0_90, %c0_91], %191 {strides = array<i32>} : memref<8x32xf32, #tpu.memory_space<vmem>>, vector<8x8xf32>,
    %193 = vector.extract_strided_slice %160 {offsets = [0, 8], sizes = [8, 8], strides = [1, 1]} : vector<8x32xbf16> to vector<8x8xbf16>
    %194 = vector.extract_strided_slice %170 {offsets = [0, 8], sizes = [8, 8], strides = [1, 1]} : vector<8x32xbf16> to vector<8x8xbf16>
    %cst_92 = arith.constant dense<0.000000e+00> : vector<8x8xf32>
    %195 = tpu.matmul %193, %194, %cst_92 {dimension_numbers = #tpu.dot_dimension_numbers<[1], [1], [0], [0], [0, 0, 1, 0], [], []>} : vector<8x8xbf16>, vector<8x8xbf16>, vector<8x8xf32> -> vector<8x8xf32>
    %cst_93 = arith.constant 0.353553385 : f32
    %196 = vector.broadcast %cst_93 : f32 to vector<8x8xf32>
    %197 = arith.mulf %195, %196 : vector<8x8xf32>
    %198 = vector.broadcast %27 : vector<1x8xf32> to vector<8x8xf32>
    %199 = arith.addf %197, %198 : vector<8x8xf32>
    %cst_94 = arith.constant dense<0xFF800000> : vector<8xf32>
    %200 = vector.multi_reduction <maximumf>, %199, %cst_94 [1] : vector<8x8xf32> to vector<8xf32>
    %201 = vector.shape_cast %200 : vector<8xf32> to vector<8x1xf32>
    %202 = vector.broadcast %201 : vector<8x1xf32> to vector<8x8xf32>
    %203 = arith.subf %199, %202 : vector<8x8xf32>
    %204 = math.exp %203 : vector<8x8xf32>
    %cst_95 = arith.constant dense<0.000000e+00> : vector<8xf32>
    %205 = vector.multi_reduction <add>, %204, %cst_95 [1] : vector<8x8xf32> to vector<8xf32>
    %206 = vector.shape_cast %205 : vector<8xf32> to vector<8x1xf32>
    %207 = tpu.reciprocal %206 {approx = true} : vector<8x1xf32> -> vector<8x1xf32>
    %208 = vector.broadcast %207 : vector<8x1xf32> to vector<8x8xf32>
    %209 = arith.mulf %204, %208 : vector<8x8xf32>
    %210 = arith.truncf %209 : vector<8x8xf32> to vector<8x8xbf16>
    %211 = vector.extract_strided_slice %171 {offsets = [0, 8], sizes = [8, 8], strides = [1, 1]} : vector<8x32xbf16> to vector<8x8xbf16>
    %cst_96 = arith.constant dense<0.000000e+00> : vector<8x8xf32>
    %212 = tpu.matmul %210, %211, %cst_96 {dimension_numbers = #tpu.dot_dimension_numbers<[1], [0], [0], [1], [0, 0, 1, 1], [], []>} : vector<8x8xbf16>, vector<8x8xbf16>, vector<8x8xf32> -> vector<8x8xf32>
    %c0_97 = arith.constant 0 : index
    %c8_98 = arith.constant 8 : index
    %213 = vector.load %arg25[%c0_97, %c8_98] : memref<8x32xf32, #tpu.memory_space<vmem>>, vector<8x8xf32>
    tpu.vector_store %arg25[%c0_97, %c8_98], %212 {strides = array<i32>} : memref<8x32xf32, #tpu.memory_space<vmem>>, vector<8x8xf32>,
    %214 = vector.extract_strided_slice %160 {offsets = [0, 16], sizes = [8, 8], strides = [1, 1]} : vector<8x32xbf16> to vector<8x8xbf16>
    %215 = vector.extract_strided_slice %170 {offsets = [0, 16], sizes = [8, 8], strides = [1, 1]} : vector<8x32xbf16> to vector<8x8xbf16>
    %cst_99 = arith.constant dense<0.000000e+00> : vector<8x8xf32>
    %216 = tpu.matmul %214, %215, %cst_99 {dimension_numbers = #tpu.dot_dimension_numbers<[1], [1], [0], [0], [0, 0, 1, 0], [], []>} : vector<8x8xbf16>, vector<8x8xbf16>, vector<8x8xf32> -> vector<8x8xf32>
    %cst_100 = arith.constant 0.353553385 : f32
    %217 = vector.broadcast %cst_100 : f32 to vector<8x8xf32>
    %218 = arith.mulf %216, %217 : vector<8x8xf32>
    %219 = vector.broadcast %27 : vector<1x8xf32> to vector<8x8xf32>
    %220 = arith.addf %218, %219 : vector<8x8xf32>
    %cst_101 = arith.constant dense<0xFF800000> : vector<8xf32>
    %221 = vector.multi_reduction <maximumf>, %220, %cst_101 [1] : vector<8x8xf32> to vector<8xf32>
    %222 = vector.shape_cast %221 : vector<8xf32> to vector<8x1xf32>
    %223 = vector.broadcast %222 : vector<8x1xf32> to vector<8x8xf32>
    %224 = arith.subf %220, %223 : vector<8x8xf32>
    %225 = math.exp %224 : vector<8x8xf32>
    %cst_102 = arith.constant dense<0.000000e+00> : vector<8xf32>
    %226 = vector.multi_reduction <add>, %225, %cst_102 [1] : vector<8x8xf32> to vector<8xf32>
    %227 = vector.shape_cast %226 : vector<8xf32> to vector<8x1xf32>
    %228 = tpu.reciprocal %227 {approx = true} : vector<8x1xf32> -> vector<8x1xf32>
    %229 = vector.broadcast %228 : vector<8x1xf32> to vector<8x8xf32>
    %230 = arith.mulf %225, %229 : vector<8x8xf32>
    %231 = arith.truncf %230 : vector<8x8xf32> to vector<8x8xbf16>
    %232 = vector.extract_strided_slice %171 {offsets = [0, 16], sizes = [8, 8], strides = [1, 1]} : vector<8x32xbf16> to vector<8x8xbf16>
    %cst_103 = arith.constant dense<0.000000e+00> : vector<8x8xf32>
    %233 = tpu.matmul %231, %232, %cst_103 {dimension_numbers = #tpu.dot_dimension_numbers<[1], [0], [0], [1], [0, 0, 1, 1], [], []>} : vector<8x8xbf16>, vector<8x8xbf16>, vector<8x8xf32> -> vector<8x8xf32>
    %c0_104 = arith.constant 0 : index
    %c16_105 = arith.constant 16 : index
    %234 = vector.load %arg25[%c0_104, %c16_105] : memref<8x32xf32, #tpu.memory_space<vmem>>, vector<8x8xf32>
    tpu.vector_store %arg25[%c0_104, %c16_105], %233 {strides = array<i32>} : memref<8x32xf32, #tpu.memory_space<vmem>>, vector<8x8xf32>,
    %235 = vector.extract_strided_slice %160 {offsets = [0, 24], sizes = [8, 8], strides = [1, 1]} : vector<8x32xbf16> to vector<8x8xbf16>
    %236 = vector.extract_strided_slice %170 {offsets = [0, 24], sizes = [8, 8], strides = [1, 1]} : vector<8x32xbf16> to vector<8x8xbf16>
    %cst_106 = arith.constant dense<0.000000e+00> : vector<8x8xf32>
    %237 = tpu.matmul %235, %236, %cst_106 {dimension_numbers = #tpu.dot_dimension_numbers<[1], [1], [0], [0], [0, 0, 1, 0], [], []>} : vector<8x8xbf16>, vector<8x8xbf16>, vector<8x8xf32> -> vector<8x8xf32>
    %cst_107 = arith.constant 0.353553385 : f32
    %238 = vector.broadcast %cst_107 : f32 to vector<8x8xf32>
    %239 = arith.mulf %237, %238 : vector<8x8xf32>
    %240 = vector.broadcast %27 : vector<1x8xf32> to vector<8x8xf32>
    %241 = arith.addf %239, %240 : vector<8x8xf32>
    %cst_108 = arith.constant dense<0xFF800000> : vector<8xf32>
    %242 = vector.multi_reduction <maximumf>, %241, %cst_108 [1] : vector<8x8xf32> to vector<8xf32>
    %243 = vector.shape_cast %242 : vector<8xf32> to vector<8x1xf32>
    %244 = vector.broadcast %243 : vector<8x1xf32> to vector<8x8xf32>
    %245 = arith.subf %241, %244 : vector<8x8xf32>
    %246 = math.exp %245 : vector<8x8xf32>
    %cst_109 = arith.constant dense<0.000000e+00> : vector<8xf32>
    %247 = vector.multi_reduction <add>, %246, %cst_109 [1] : vector<8x8xf32> to vector<8xf32>
    %248 = vector.shape_cast %247 : vector<8xf32> to vector<8x1xf32>
    %249 = tpu.reciprocal %248 {approx = true} : vector<8x1xf32> -> vector<8x1xf32>
    %250 = vector.broadcast %249 : vector<8x1xf32> to vector<8x8xf32>
    %251 = arith.mulf %246, %250 : vector<8x8xf32>
    %252 = arith.truncf %251 : vector<8x8xf32> to vector<8x8xbf16>
    %253 = vector.extract_strided_slice %171 {offsets = [0, 24], sizes = [8, 8], strides = [1, 1]} : vector<8x32xbf16> to vector<8x8xbf16>
    %cst_110 = arith.constant dense<0.000000e+00> : vector<8x8xf32>
    %254 = tpu.matmul %252, %253, %cst_110 {dimension_numbers = #tpu.dot_dimension_numbers<[1], [0], [0], [1], [0, 0, 1, 1], [], []>} : vector<8x8xbf16>, vector<8x8xbf16>, vector<8x8xf32> -> vector<8x8xf32>
    %c0_111 = arith.constant 0 : index
    %c24_112 = arith.constant 24 : index
    %255 = vector.load %arg25[%c0_111, %c24_112] : memref<8x32xf32, #tpu.memory_space<vmem>>, vector<8x8xf32>
    tpu.vector_store %arg25[%c0_111, %c24_112], %254 {strides = array<i32>} : memref<8x32xf32, #tpu.memory_space<vmem>>, vector<8x8xf32>,
    %c0_113 = arith.constant 0 : index
    %c0_114 = arith.constant 0 : index
    %256 = vector.load %arg25[%c0_113, %c0_114] : memref<8x32xf32, #tpu.memory_space<vmem>>, vector<8x32xf32>
    %257 = arith.truncf %256 : vector<8x32xf32> to vector<8x32xbf16>
    %c0_115 = arith.constant 0 : index
    %c0_116 = arith.constant 0 : index
    %c0_117 = arith.constant 0 : index
    %258 = vector.load %arg16[%c0_115, %c0_116, %c0_117] : memref<1x32x32xbf16, #tpu.memory_space<vmem>>, vector<1x32x32xbf16>
    %259 = vector.shape_cast %258 : vector<1x32x32xbf16> to vector<32x32xbf16>
    %cst_118 = arith.constant dense<0.000000e+00> : vector<8x32xf32>
    %260 = tpu.matmul %257, %259, %cst_118 {dimension_numbers = #tpu.dot_dimension_numbers<[1], [0], [0], [1], [0, 0, 1, 1], [], []>} : vector<8x32xbf16>, vector<32x32xbf16>, vector<8x32xf32> -> vector<8x32xf32>
    %c0_119 = arith.constant 0 : index
    %c0_120 = arith.constant 0 : index
    %c0_121 = arith.constant 0 : index
    %261 = vector.load %arg17[%c0_119, %c0_120, %c0_121] : memref<1x1x32xf32, #tpu.memory_space<vmem>>, vector<1x1x32xf32>
    %262 = vector.shape_cast %261 : vector<1x1x32xf32> to vector<1x32xf32>
    %263 = vector.broadcast %262 : vector<1x32xf32> to vector<8x32xf32>
    %264 = arith.addf %260, %263 : vector<8x32xf32>
    %265 = arith.addf %264, %151 : vector<8x32xf32>
    %266 = vector.extract_strided_slice %8 {offsets = [1, 0], sizes = [1, 32], strides = [1, 1]} : vector<3x32xf32> to vector<1x32xf32>
    %267 = vector.extract_strided_slice %10 {offsets = [1, 0], sizes = [1, 32], strides = [1, 1]} : vector<3x32xf32> to vector<1x32xf32>
    %cst_122 = arith.constant dense<0.000000e+00> : vector<8xf32>
    %268 = vector.multi_reduction <add>, %265, %cst_122 [1] : vector<8x32xf32> to vector<8xf32>
    %269 = vector.shape_cast %268 : vector<8xf32> to vector<8x1xf32>
    %cst_123 = arith.constant 3.200000e+01 : f32
    %270 = vector.broadcast %cst_123 : f32 to vector<8x1xf32>
    %271 = arith.divf %269, %270 : vector<8x1xf32>
    %272 = vector.broadcast %271 : vector<8x1xf32> to vector<8x32xf32>
    %273 = arith.subf %265, %272 : vector<8x32xf32>
    %274 = arith.mulf %273, %273 : vector<8x32xf32>
    %cst_124 = arith.constant dense<0.000000e+00> : vector<8xf32>
    %275 = vector.multi_reduction <add>, %274, %cst_124 [1] : vector<8x32xf32> to vector<8xf32>
    %276 = vector.shape_cast %275 : vector<8xf32> to vector<8x1xf32>
    %cst_125 = arith.constant 3.200000e+01 : f32
    %277 = vector.broadcast %cst_125 : f32 to vector<8x1xf32>
    %278 = arith.divf %276, %277 : vector<8x1xf32>
    %cst_126 = arith.constant 9.99999974E-6 : f32
    %279 = vector.broadcast %cst_126 : f32 to vector<8x1xf32>
    %280 = arith.addf %278, %279 : vector<8x1xf32>
    %281 = math.rsqrt %280 : vector<8x1xf32>
    %282 = vector.broadcast %281 : vector<8x1xf32> to vector<8x32xf32>
    %283 = arith.mulf %273, %282 : vector<8x32xf32>
    %284 = vector.broadcast %266 : vector<1x32xf32> to vector<8x32xf32>
    %285 = arith.mulf %283, %284 : vector<8x32xf32>
    %286 = vector.broadcast %267 : vector<1x32xf32> to vector<8x32xf32>
    %287 = arith.addf %285, %286 : vector<8x32xf32>
    %288 = arith.truncf %287 : vector<8x32xf32> to vector<8x32xbf16>
    %c0_127 = arith.constant 0 : index
    %c0_128 = arith.constant 0 : index
    %c0_129 = arith.constant 0 : index
    %289 = vector.load %arg18[%c0_127, %c0_128, %c0_129] : memref<1x32x64xbf16, #tpu.memory_space<vmem>>, vector<1x32x64xbf16>
    %290 = vector.shape_cast %289 : vector<1x32x64xbf16> to vector<32x64xbf16>
    %cst_130 = arith.constant dense<0.000000e+00> : vector<8x64xf32>
    %291 = tpu.matmul %288, %290, %cst_130 {dimension_numbers = #tpu.dot_dimension_numbers<[1], [0], [0], [1], [0, 0, 1, 1], [], []>} : vector<8x32xbf16>, vector<32x64xbf16>, vector<8x64xf32> -> vector<8x64xf32>
    %c0_131 = arith.constant 0 : index
    %c0_132 = arith.constant 0 : index
    %c0_133 = arith.constant 0 : index
    %292 = vector.load %arg19[%c0_131, %c0_132, %c0_133] : memref<1x1x64xf32, #tpu.memory_space<vmem>>, vector<1x1x64xf32>
    %293 = vector.shape_cast %292 : vector<1x1x64xf32> to vector<1x64xf32>
    %294 = vector.broadcast %293 : vector<1x64xf32> to vector<8x64xf32>
    %295 = arith.addf %291, %294 : vector<8x64xf32>
    %cst_134 = arith.constant 0.000000e+00 : f32
    %296 = vector.broadcast %cst_134 : f32 to vector<8x64xf32>
    %297 = arith.maximumf %295, %296 : vector<8x64xf32>
    %298 = arith.truncf %297 : vector<8x64xf32> to vector<8x64xbf16>
    %c0_135 = arith.constant 0 : index
    %c0_136 = arith.constant 0 : index
    %c0_137 = arith.constant 0 : index
    %299 = vector.load %arg20[%c0_135, %c0_136, %c0_137] : memref<1x64x32xbf16, #tpu.memory_space<vmem>>, vector<1x64x32xbf16>
    %300 = vector.shape_cast %299 : vector<1x64x32xbf16> to vector<64x32xbf16>
    %cst_138 = arith.constant dense<0.000000e+00> : vector<8x32xf32>
    %301 = tpu.matmul %298, %300, %cst_138 {dimension_numbers = #tpu.dot_dimension_numbers<[1], [0], [0], [1], [0, 0, 1, 1], [], []>} : vector<8x64xbf16>, vector<64x32xbf16>, vector<8x32xf32> -> vector<8x32xf32>
    %c0_139 = arith.constant 0 : index
    %c0_140 = arith.constant 0 : index
    %c0_141 = arith.constant 0 : index
    %302 = vector.load %arg21[%c0_139, %c0_140, %c0_141] : memref<1x1x32xf32, #tpu.memory_space<vmem>>, vector<1x1x32xf32>
    %303 = vector.shape_cast %302 : vector<1x1x32xf32> to vector<1x32xf32>
    %304 = vector.broadcast %303 : vector<1x32xf32> to vector<8x32xf32>
    %305 = arith.addf %301, %304 : vector<8x32xf32>
    %306 = arith.addf %305, %287 : vector<8x32xf32>
    %307 = vector.extract_strided_slice %8 {offsets = [2, 0], sizes = [1, 32], strides = [1, 1]} : vector<3x32xf32> to vector<1x32xf32>
    %308 = vector.extract_strided_slice %10 {offsets = [2, 0], sizes = [1, 32], strides = [1, 1]} : vector<3x32xf32> to vector<1x32xf32>
    %cst_142 = arith.constant dense<0.000000e+00> : vector<8xf32>
    %309 = vector.multi_reduction <add>, %306, %cst_142 [1] : vector<8x32xf32> to vector<8xf32>
    %310 = vector.shape_cast %309 : vector<8xf32> to vector<8x1xf32>
    %cst_143 = arith.constant 3.200000e+01 : f32
    %311 = vector.broadcast %cst_143 : f32 to vector<8x1xf32>
    %312 = arith.divf %310, %311 : vector<8x1xf32>
    %313 = vector.broadcast %312 : vector<8x1xf32> to vector<8x32xf32>
    %314 = arith.subf %306, %313 : vector<8x32xf32>
    %315 = arith.mulf %314, %314 : vector<8x32xf32>
    %cst_144 = arith.constant dense<0.000000e+00> : vector<8xf32>
    %316 = vector.multi_reduction <add>, %315, %cst_144 [1] : vector<8x32xf32> to vector<8xf32>
    %317 = vector.shape_cast %316 : vector<8xf32> to vector<8x1xf32>
    %cst_145 = arith.constant 3.200000e+01 : f32
    %318 = vector.broadcast %cst_145 : f32 to vector<8x1xf32>
    %319 = arith.divf %317, %318 : vector<8x1xf32>
    %cst_146 = arith.constant 9.99999974E-6 : f32
    %320 = vector.broadcast %cst_146 : f32 to vector<8x1xf32>
    %321 = arith.addf %319, %320 : vector<8x1xf32>
    %322 = math.rsqrt %321 : vector<8x1xf32>
    %323 = vector.broadcast %322 : vector<8x1xf32> to vector<8x32xf32>
    %324 = arith.mulf %314, %323 : vector<8x32xf32>
    %325 = vector.broadcast %307 : vector<1x32xf32> to vector<8x32xf32>
    %326 = arith.mulf %324, %325 : vector<8x32xf32>
    %327 = vector.broadcast %308 : vector<1x32xf32> to vector<8x32xf32>
    %328 = arith.addf %326, %327 : vector<8x32xf32>
    %c0_147 = arith.constant 0 : index
    %c0_148 = arith.constant 0 : index
    %c0_149 = arith.constant 0 : index
    %329 = vector.load %arg24[%c0_147, %c0_148, %c0_149] : memref<1x8x32xf32, #tpu.memory_space<vmem>>, vector<1x8x32xf32>
    %330 = vector.shape_cast %329 : vector<1x8x32xf32> to vector<8x32xf32>
    %331 = vector.shape_cast %328 : vector<8x32xf32> to vector<1x8x32xf32>
    tpu.vector_store %arg24[%c0_147, %c0_148, %c0_149], %331 {strides = array<i32>} : memref<1x8x32xf32, #tpu.memory_space<vmem>>, vector<1x8x32xf32>,
    return
  }
  func.func @transform_0(%arg0: i32, %arg1: i32) -> (i32, i32, i32) {
    %c0_i32 = arith.constant 0 : i32
    %c0_i32_0 = arith.constant 0 : i32
    %c0_i32_1 = arith.constant 0 : i32
    return %arg0, %c0_i32, %c0_i32_0 : i32, i32, i32
  }
  func.func @transform_1(%arg0: i32, %arg1: i32) -> (i32, i32, i32) {
    %c0_i32 = arith.constant 0 : i32
    %c0_i32_0 = arith.constant 0 : i32
    %c0_i32_1 = arith.constant 0 : i32
    return %arg0, %c0_i32, %c0_i32_0 : i32, i32, i32
  }
  func.func @transform_2(%arg0: i32, %arg1: i32) -> (i32, i32) {
    %c0_i32 = arith.constant 0 : i32
    %c0_i32_0 = arith.constant 0 : i32
    %c0_i32_1 = arith.constant 0 : i32
    return %c0_i32, %c0_i32_0 : i32, i32
  }
  func.func @transform_3(%arg0: i32, %arg1: i32) -> (i32, i32) {
    %c0_i32 = arith.constant 0 : i32
    %c0_i32_0 = arith.constant 0 : i32
    %c0_i32_1 = arith.constant 0 : i32
    return %c0_i32, %c0_i32_0 : i32, i32
  }
  func.func @transform_4(%arg0: i32, %arg1: i32) -> (i32, i32, i32) {
    %c0_i32 = arith.constant 0 : i32
    %c0_i32_0 = arith.constant 0 : i32
    %c0_i32_1 = arith.constant 0 : i32
    return %arg0, %c0_i32, %c0_i32_0 : i32, i32, i32
  }
  func.func @transform_5(%arg0: i32, %arg1: i32) -> (i32, i32, i32) {
    %c0_i32 = arith.constant 0 : i32
    %c0_i32_0 = arith.constant 0 : i32
    %c0_i32_1 = arith.constant 0 : i32
    return %arg0, %c0_i32, %c0_i32_0 : i32, i32, i32
  }
  func.func @transform_6(%arg0: i32, %arg1: i32) -> (i32, i32, i32) {
    %c0_i32 = arith.constant 0 : i32
    %c0_i32_0 = arith.constant 0 : i32
    %c0_i32_1 = arith.constant 0 : i32
    return %arg1, %c0_i32, %c0_i32_0 : i32, i32, i32
  }
  func.func @transform_7(%arg0: i32, %arg1: i32) -> (i32, i32, i32) {
    %c0_i32 = arith.constant 0 : i32
    %c0_i32_0 = arith.constant 0 : i32
    %c0_i32_1 = arith.constant 0 : i32
    return %arg1, %c0_i32, %c0_i32_0 : i32, i32, i32
  }
  func.func @transform_8(%arg0: i32, %arg1: i32) -> (i32, i32, i32) {
    %c0_i32 = arith.constant 0 : i32
    %c0_i32_0 = arith.constant 0 : i32
    %c0_i32_1 = arith.constant 0 : i32
    return %arg1, %c0_i32, %c0_i32_0 : i32, i32, i32
  }
  func.func @transform_9(%arg0: i32, %arg1: i32) -> (i32, i32, i32) {
    %c0_i32 = arith.constant 0 : i32
    %c0_i32_0 = arith.constant 0 : i32
    %c0_i32_1 = arith.constant 0 : i32
    return %arg1, %c0_i32, %c0_i32_0 : i32, i32, i32
  }
  func.func @transform_10(%arg0: i32, %arg1: i32) -> (i32, i32, i32) {
    %c0_i32 = arith.constant 0 : i32
    %c0_i32_0 = arith.constant 0 : i32
    %c0_i32_1 = arith.constant 0 : i32
    return %arg1, %c0_i32, %c0_i32_0 : i32, i32, i32
  }
  func.func @transform_11(%arg0: i32, %arg1: i32) -> (i32, i32, i32) {
    %c0_i32 = arith.constant 0 : i32
    %c0_i32_0 = arith.constant 0 : i32
    %c0_i32_1 = arith.constant 0 : i32
    return %arg1, %c0_i32, %c0_i32_0 : i32, i32, i32
  }
  func.func @transform_12(%arg0: i32, %arg1: i32) -> (i32, i32, i32) {
    %c0_i32 = arith.constant 0 : i32
    %c0_i32_0 = arith.constant 0 : i32
    %c0_i32_1 = arith.constant 0 : i32
    return %arg1, %c0_i32, %c0_i32_0 : i32, i32, i32
  }
  func.func @transform_13(%arg0: i32, %arg1: i32) -> (i32, i32, i32) {
    %c0_i32 = arith.constant 0 : i32
    %c0_i32_0 = arith.constant 0 : i32
    %c0_i32_1 = arith.constant 0 : i32
    return %arg1, %c0_i32, %c0_i32_0 : i32, i32, i32
  }
  func.func @transform_14(%arg0: i32, %arg1: i32) -> (i32, i32, i32) {
    %c0_i32 = arith.constant 0 : i32
    %c0_i32_0 = arith.constant 0 : i32
    %c0_i32_1 = arith.constant 0 : i32
    return %arg1, %c0_i32, %c0_i32_0 : i32, i32, i32
  }
  func.func @transform_15(%arg0: i32, %arg1: i32) -> (i32, i32, i32) {
    %c0_i32 = arith.constant 0 : i32
    %c0_i32_0 = arith.constant 0 : i32
    %c0_i32_1 = arith.constant 0 : i32
    return %arg1, %c0_i32, %c0_i32_0 : i32, i32, i32
  }
  func.func @transform_16(%arg0: i32, %arg1: i32) -> (i32, i32, i32) {
    %c0_i32 = arith.constant 0 : i32
    %c0_i32_0 = arith.constant 0 : i32
    %c0_i32_1 = arith.constant 0 : i32
    return %arg1, %c0_i32, %c0_i32_0 : i32, i32, i32
  }
  func.func @transform_17(%arg0: i32, %arg1: i32) -> (i32, i32, i32) {
    %c0_i32 = arith.constant 0 : i32
    %c0_i32_0 = arith.constant 0 : i32
    %c0_i32_1 = arith.constant 0 : i32
    return %arg1, %c0_i32, %c0_i32_0 : i32, i32, i32
  }
  func.func @transform_18(%arg0: i32, %arg1: i32) -> (i32, i32, i32) {
    %c0_i32 = arith.constant 0 : i32
    %c0_i32_0 = arith.constant 0 : i32
    %c0_i32_1 = arith.constant 0 : i32
    return %arg1, %c0_i32, %c0_i32_0 : i32, i32, i32
  }
  func.func @transform_19(%arg0: i32, %arg1: i32) -> (i32, i32, i32) {
    %c0_i32 = arith.constant 0 : i32
    %c0_i32_0 = arith.constant 0 : i32
    %c0_i32_1 = arith.constant 0 : i32
    return %arg1, %c0_i32, %c0_i32_0 : i32, i32, i32
  }
  func.func @transform_20(%arg0: i32, %arg1: i32) -> (i32, i32, i32) {
    %c0_i32 = arith.constant 0 : i32
    %c0_i32_0 = arith.constant 0 : i32
    %c0_i32_1 = arith.constant 0 : i32
    return %arg1, %c0_i32, %c0_i32_0 : i32, i32, i32
  }
  func.func @transform_21(%arg0: i32, %arg1: i32) -> (i32, i32, i32) {
    %c0_i32 = arith.constant 0 : i32
    %c0_i32_0 = arith.constant 0 : i32
    %c0_i32_1 = arith.constant 0 : i32
    return %arg1, %c0_i32, %c0_i32_0 : i32, i32, i32
  }
  func.func @transform_22(%arg0: i32, %arg1: i32) -> (i32, i32, i32) {
    %c0_i32 = arith.constant 0 : i32
    %c0_i32_0 = arith.constant 0 : i32
    %c0_i32_1 = arith.constant 0 : i32
    return %arg0, %c0_i32, %c0_i32_0 : i32, i32, i32
  }
}

</mosaic_0001>

<bundles_post_ra>
// kernel: decoder_forward.1
= control target key start
LH: loop header
LB: loop body
LE: loop exit
PB: predicated region body
PF: predicated region fallthrough
CT: control target
= control target key end

     0   :  { %s3135_s0 = inlined_call_operand.vmem [shape: f32[2,8,32], index: 0, kind: input, shape index: {}]   ;;  %s3136_s1 = inlined_call_operand.vmem [shape: f32[2,8,32], index: 1, kind: input, shape index: {}]   ;;  %s3137_s2 = inlined_call_operand.vmem [shape: f32[8,32], index: 2, kind: input, shape index: {}]   ;;  %s3138_s3 = inlined_call_operand.vmem [shape: f32[8,8], index: 3, kind: input, shape index: {}]   ;;  %s3139_s4 = inlined_call_operand.vmem [shape: f32[2,1,8], index: 4, kind: input, shape index: {}]   ;;  %s3140_s5 = inlined_call_operand.vmem [shape: f32[2,1,8], index: 5, kind: input, shape index: {}]   ;;  %s3141_s6 = inlined_call_operand.vmem [shape: bf16[2,32,96], index: 6, kind: input, shape index: {}]   ;;  %s3142_s7 = inlined_call_operand.vmem [shape: f32[2,1,96], index: 7, kind: input, shape index: {}]   ;;  %s3143_s8 = inlined_call_operand.vmem [shape: bf16[2,32,32], index: 8, kind: input, shape index: {}]   ;;  %s3144_s9 = inlined_call_operand.vmem [shape: f32[2,1,32], index: 9, kind: input, shape index: {}]   ;;  %s3145_s10 = inlined_call_operand.vmem [shape: bf16[2,32,32], index: 10, kind: input, shape index: {}]   ;;  %s3146_s11 = inlined_call_operand.vmem [shape: f32[2,1,32], index: 11, kind: input, shape index: {}]   ;;  %s3147_s12 = inlined_call_operand.vmem [shape: bf16[2,32,64], index: 12, kind: input, shape index: {}]   ;;  %s3148_s13 = inlined_call_operand.vmem [shape: f32[2,1,64], index: 13, kind: input, shape index: {}]   ;;  %s3149_s14 = inlined_call_operand.vmem [shape: bf16[2,32,32], index: 14, kind: input, shape index: {}]   ;;  %s3150_s15 = inlined_call_operand.vmem [shape: f32[2,1,32], index: 15, kind: input, shape index: {}]   ;;  %s3151_s16 = inlined_call_operand.vmem [shape: bf16[2,32,64], index: 16, kind: input, shape index: {}]   ;;  %s3152_s17 = inlined_call_operand.vmem [shape: f32[2,1,64], index: 17, kind: input, shape index: {}]   ;;  %s3153_s18 = inlined_call_operand.vmem [shape: bf16[2,64,32], index: 18, kind: input, shape index: {}]   ;;  %s3154_s19 = inlined_call_operand.vmem [shape: f32[2,1,32], index: 19, kind: input, shape index: {}]   ;;  %s3155_s20 = inlined_call_operand.vmem [shape: f32[2,3,32], index: 20, kind: input, shape index: {}]   ;;  %s3156_s21 = inlined_call_operand.vmem [shape: f32[2,3,32], index: 21, kind: input, shape index: {}]   ;;  %s3157_s22 = inlined_call_operand.hbm [shape: f32[2,8,32], index: 22, kind: output, shape index: {}]  }
   0x1   :  { %3175 = sst [smem:[#allocation22_spill]] %s3135_s0 }
   0x2   :  { %3176 = sst [smem:[#allocation23_spill]] %s3136_s1 }
   0x3   :  { %3177 = sst [smem:[#allocation24_spill]] %s3137_s2 }
   0x4   :  { %3178 = sst [smem:[#allocation25_spill]] %s3138_s3 }
   0x5   :  { %3179 = sst [smem:[#allocation26_spill]] %s3139_s4 }
   0x6   :  { %3180 = sst [smem:[#allocation27_spill]] %s3140_s5 }
   0x7   :  { %3181 = sst [smem:[#allocation28_spill]] %s3141_s6 }
   0x8   :  { %3182 = sst [smem:[#allocation29_spill]] %s3143_s8 }
   0x9   :  { %3183 = sst [smem:[#allocation30_spill]] %s3145_s10 }
   0xa   :  { %3184 = sst [smem:[#allocation31_spill]] %s3146_s11 }
   0xb   :  { %3185 = sst [smem:[#allocation32_spill]] %s3147_s12 }
   0xc   :  { %3186 = sst [smem:[#allocation33_spill]] %s3148_s13 }
   0xd   :  { %3187 = sst [smem:[#allocation34_spill]] %s3149_s14 }
   0xe   :  { %3188 = sst [smem:[#allocation35_spill]] %s3151_s16 }
   0xf   :  { %3189 = sst [smem:[#allocation36_spill]] %s3152_s17 }
  0x10   :  { %3190 = sst [smem:[#allocation37_spill]] %s3153_s18 }
  0x11   :  { %3191 = sst [smem:[#allocation38_spill]] %s3154_s19 }
  0x12   :  { %3192 = sst [smem:[#allocation39_spill]] %s3155_s20 }
  0x13   :  { %3193 = sst [smem:[#allocation40_spill]] %s3156_s21 }
  0x14   :  { %3194 = sst [smem:[#allocation41_spill]] %s3157_s22 }
  0x15   :  { %27 = vsyncpa [#allocation4], 0 }
  0x16   :  { %29 = vsyncpa [#allocation4 + $0x1], 0  ;;  %s2701_s3 = smov 0   ;;  %s2703_s28 = smov 0  }
  0x17   :  { %s2705_s29 = smov 0   ;;  %s2707_s30 = smov 0  }
  0x18   :  { %s2709_s4 = smov 0   ;;  %s2711_s0 = smov 0  }
  0x19   :  { %s2713_s23 = smov 0   ;;  %s2715_s1 = smov 0  }
  0x1a LB: > { %3195 = sst [smem:[#allocation6_spill]] %s2540_s3  ;;  %s2200_s5 = sadd.s32 4294967295, %s2568_s1   ;;  %s2568_s1 = sphi %s2715_s1, %s35_s1   ;;  %s2564_s23 = sphi %s2713_s23, %s3264_s23   ;;  %s2560_s0 = sphi %s2711_s0, %s3263_s0   ;;  %s2556_s4 = sphi %s2709_s4, %s3262_s4   ;;  %s2552_s30 = sphi %s2707_s30, %s3261_s30   ;;  %s2548_s29 = sphi %s2705_s29, %s3260_s29   ;;  %s2544_s28 = sphi %s2703_s28, %s3259_s28   ;;  %s2540_s3 = sphi %s2701_s3, %s3258_s3  }
  0x1b   : > { %3196 = sst [smem:[#allocation7_spill]] %s2544_s28  ;;  %s2201_s24 = sadd.s32 4294967294, %s2568_s1  }
  0x1c   : > { %3197 = sst [smem:[#allocation8_spill]] %s2548_s29  ;;  %s44_s6 = sadd.s32 1, %s2560_s0 }
  0x1d   : > { %3198 = sst [smem:[#allocation9_spill]] %s2552_s30  ;;  %p45_p0 = scmp.ge.s32.totalorder %s44_s6, 2 }
  0x1e   : > { %3199 = sst [smem:[#allocation10_spill]] %s2556_s4  ;;  %s47_s25 = sadd.s32 1, %s2564_s23 }
  0x1f   : > { %3200 = sst [smem:[#allocation11_spill]] %s2560_s0  ;;  %p626_p1 = scmp.ne.s32.totalorder %s2548_s29, %s2544_s28 }
  0x20   : > { %3201 = sst [smem:[#allocation12_spill]] %s2564_s23  ;;  %p627_p2 = scmp.eq.s32.totalorder %s2200_s5, 3 }
  0x21   : > { %3202 = sst [smem:[#allocation13_spill]] %s2568_s1  ;;  %s3266_s6 = smov (%p45_p0, %s44_s6), 0 }
  0x22   : > { %3203 = sst [smem:[#allocation14_spill]] %s3266_s6  ;;  %s3268_s25 = smov (!%p45_p0, %s47_s25), %s2564_s23 }
  0x23   : > { %p2750_p3 = por %p627_p2, %p626_p1  ;;  %p632_p4 = scmp.ne.s32.totalorder %s2544_s28, %s2540_s3 }
  0x24   : > { %p49_p5 = scmp.ge.s32.totalorder %s3268_s25, 2  ;;  %p633_p6 = scmp.eq.s32.totalorder %s2201_s24, 3 }
  0x25   : > { %s3204_s26 = scalar_select %p2750_p3, 1, 0 }
  0x26   : > { %p2204_p7 = scmp.ge.s32.totalorder %s2568_s1, 1  ;;  %p795_p8 = scmp.lt.s32.totalorder %s2568_s1, 5 }
  0x27   : > { %3205 = sst [smem:[#allocation15_spill]] %s3204_s26  ;;  %s3270_s25 = smov (%p49_p5, %s3268_s25), 0 }
  0x28   : > { %3206 = sst [smem:[#allocation16_spill]] %s3270_s25  ;;  %p2760_p9 = por %p633_p6, %p632_p4 }
  0x29   : > { %p796_p10 = pnand %p2204_p7, %p795_p8  ;;  %s613_s27 = ssub.s32 %s2564_s23, %s3270_s25 }
  0x2a   : > { %s3207_s2 = scalar_select %p2760_p9, 1, 0 }
  0x2b   : > { %s616_s5 = sadd.s32 1, %s2548_s29  ;;  %p614_p11 = scmp.eq.s32.totalorder %s613_s27, 0 }
  0x2c   : > { %3208 = sst [smem:[#allocation17_spill]] %s3207_s2  ;;  %799 = sbr.rel (%p796_p10) target bundleno = 3313 (0xcf1), region = 108 }
  0x2d   : > { %s2768_s6 = scalar_select %p614_p11, %s2548_s29, %s616_s5  }
  0x2f   : > { %3209 = sst [smem:[#allocation18_spill]] %s2768_s6 }
  0x31   : > { %s3163_s24 = sand.u32 1, %s2544_s28   ;;  %p930_p12 = scmp.lt.s32.totalorder %s2556_s4, 1 }
  0x32   : > { %s2205_s0 = sshll.u32 %s3163_s24, 3  ;;  %p944_p13 = scmp.lt.s32.totalorder %s2552_s30, 1 }
  0x33   : > { %s2776_s3 = scalar_select %p930_p12, %s2556_s4, 1 }
  0x34   : > { %s2779_s27 = scalar_select %p944_p13, %s2552_s30, 1 }
  0x35   : > { %s2206_s5 = sshll.u32 %s2776_s3, 3  ;;  %s3211_s1 = sld [smem:[#allocation22_spill]] }
  0x36   : > { %s3212_s4 = sld [smem:[#allocation23_spill]]  ;;  %s2316_s17 = sshll.u32 %s2779_s27, 4 }
  0x37   : > { %s3215_s6 = sld [smem:[#allocation28_spill]]  ;;  %s2322_s29 = sshll.u32 %s2779_s27, 5 }
  0x38   : > { %s3216_s8 = sld [smem:[#allocation29_spill]]  ;;  %s2222_s18 = sshll.u32 %s2779_s27, 2 }
  0x39   : > { %s3217_s10 = sld [smem:[#allocation30_spill]]  ;;  %s2872_s24 = scalar_lea.vmem [#allocation3], %s2205_s0 }
  0x3a   : > { %s3220_s12 = sld [smem:[#allocation32_spill]] }
  0x3b   : > { %s933_s26 = scalar_lea.vmem %s3211_s1, %s2206_s5  ;;  %s3222_s14 = sld [smem:[#allocation34_spill]] }
  0x3c   : > { %s2792_s30 = scalar_lea.vmem %s3212_s4, %s2206_s5  ;;  %s3226_s13 = sld [smem:[#allocation38_spill]] }
  0x3d   : > { %3213 = sst [smem:[#allocation19_spill]] %s2792_s30  ;;  %s948_s25 = scalar_lea.vmem %s3215_s6, %s2316_s17 }
  0x3e   : > { %s2809_s28 = scalar_lea.vmem %s3216_s8, %s2316_s17  ;;  %s3224_s6 = sld [smem:[#allocation35_spill]] }
  0x3f   : > { %s2818_s19 = scalar_lea.vmem %s3217_s10, %s2316_s17  ;;  %s3228_s16 = sld [smem:[#allocation39_spill]] }
  0x40   : > { %3218 = sst [smem:[#allocation20_spill]] %s2818_s19  ;;  %s2827_s1 = scalar_lea.vmem %s3220_s12, %s2316_s17 }
  0x41   : > { %s2836_s20 = scalar_lea.vmem %s3222_s14, %s2316_s17  ;;  %s3225_s12 = sld [smem:[#allocation36_spill]] }
  0x42   : > { %3223 = sst [smem:[#allocation21_spill]] %s2836_s20  ;;  %s999_s4 = scalar_lea.vmem %s3226_s13, %s2779_s27 }
  0x43   : > { %s3227_s20 = sld [smem:[#allocation37_spill]] }
  0x44   : > { %s2845_s11 = scalar_lea.vmem %s3224_s6, %s2316_s17  ;;  %s3229_s2 = sld [smem:[#allocation40_spill]] }
  0x45   : > { %s2865_s17 = scalar_lea.vmem %s3228_s16, %s2222_s18  ;;  %s3230_s8 = sld [smem:[#allocation9_spill]] }
  0x47   : > { %s991_s19 = scalar_lea.vmem %s3225_s12, %s2779_s27 }
  0x49   : > { %s2859_s30 = scalar_lea.vmem %s3227_s20, %s2322_s29 }
  0x4a   : > { %s2870_s12 = scalar_lea.vmem %s3229_s2, %s2222_s18 }
  0x4b   : > { %p2224_p0 = scmp.ne.s32.totalorder %s3230_s8, 0 }
  0x4c   : > { %s3231_s20 = sld [smem:[#allocation24_spill]] (!%p2224_p0) }
  0x4d   : > { %1012 = sbr.rel (%p2224_p0) target bundleno = 88 (0x58), region = 112 }
  0x52   : > { %v1013_v0 = vld [vmem:[%s933_s26] sm:$0xff]  ;;  %vm1017_vm0 = vcmask 261120  }
  0x53   : > { %v1015_v1 = vld [vmem:[%s3231_s20] sm:$0xff]  ;;  %v1014_v2 = vmul.f32 5.656854, %v1013_v0 }
  0x55   : > { %v1016_v3 = vadd.f32 %v1015_v1, %v1014_v2 }
  0x57   : > { %1018 = vst.msk [vmem:[%s2872_s24] sm:$0xff] %vm1017_vm0, %v1016_v3 }
  0x58 PF: > { %v2324_v4 = vld [vmem:[%s948_s25 + $0x8] sm:$0xff]  ;;  %v2323_v5 = vld [vmem:[%s948_s25] sm:$0xff]  ;;  %vm1055_vm1 = vcmask 261120   ;;  %s3232_s26 = scalar_lea.vmem %s3142_s7, %s2779_s27  ;;  %s2570_s25 = smov 104   ;;  %vm1078_vm2 = vcmask 64512   ;;  %v2577_v30 = vmov 0.0  }
  0x59   : > { %1065 = vmatpush.bf16.msra.mxu0 %v2324_v4  ;;  %v2426_v8 = vld [vmem:[%s3232_s26] ss:$0 sm:$0xff]  ;;  %s2571_s29 = smov 120   ;;  %s2572_s22 = smov 96   ;;  %vm1117_vm4 = vcmask 1043456   ;;  %vm1197_vm5 = vcmask 130112  }
  0x5a   : > { %s2573_s5 = smov 80   ;;  %s2574_s18 = smov 72   ;;  %vm1261_vm6 = vcmask 195712   ;;  %vm1325_vm7 = vcmask 261312   ;;  %vm1868_vm0 = vcmask 523264  }
  0x5b   : > { %s2575_s21 = smov 88   ;;  %s2576_s16 = smov 112  }
  0x5c   : > { %s3233_s2 = sld [smem:[#allocation26_spill]]  ;;  %s2578_s10 = smov 64  }
  0x5d   : > { %1066 = vmatpush.bf16.msra.mxu0 %v2323_v5  ;;  %s3235_s20 = sld [smem:[#allocation25_spill]]  ;;  %s2579_s0 = smov 40  }
  0x5e   : > { %v2880_v6 = vld [vmem:[%s2872_s24] sm:$0xff]  ;;  %s2580_s26 = smov 56   ;;  %s2581_s6 = smov 48  }
  0x5f   : > { %v1034_v7 = vpack.c.bf16 %v2880_v6, %v2880_v6  ;;  %s2582_s23 = smov 8   ;;  %s3236_s14 = scalar_lea.vmem %s3144_s9, %s2779_s27 }
  0x61   : > { %2233 = vmatmul.msk.bf16.vlgmr.msra.gmra.mxu0 %vm1055_vm1, %v1034_v7 }
  0x62   : > { %s3234_s8 = scalar_lea.vmem %s3233_s2, %s2776_s3  ;;  %s2583_s2 = smov 16  }
  0x63   : > { %v2427_v26 = vld [vmem:[%s3234_s8] ss:$0 sm:$0xff]  ;;  %s2584_s8 = smov 24  }
  0x64   : > { %v1023_v27 = vld [vmem:[%s3235_s20] sm:$0xff]  ;;  %s3237_s20 = sld [smem:[#allocation19_spill]] }
  0x65   : > { %v1028_v28 = vadd.f32 %v2427_v26, %v1023_v27 }
  0x67   : > { %vm1029_vm3 = vcmp.gt.f32.partialorder %v1028_v28, 0.0 }
  0x68   : > { %v1030_v31 = vsel %vm1029_vm3, -1e+09, %v2577_v30 }
  0xde   : > { %v1068_v9 = vpop.f32.mrf.mxu0 }
  0xdf   : > { %v1069_v10 = vadd.f32 %v2426_v8, %v1068_v9 }
  0xe1   : > { %v1072_v11 = vpack.c.bf16 %v1069_v10, %v1069_v10 }
  0xe3   : > { %v1074_v12 = vunpack.c.l.b16 %v1072_v11 }
  0xe5   : > { %v2890_v13 = vpack.c.b16 %v1074_v12, %v1074_v12 }
  0xe6   : > { %v1070_v14 = vpop.f32.mrf.mxu0 }
  0xe7   : > { %1263 = vrot.lane.b32.xlu2 %v2890_v13, %s2570_s25  ;;  %1135 = vrot.lane.b32.xlu1 %v2890_v13, %s2571_s29 }
  0xe8   : > { %1076 = vrot.lane.b32.xlu0 %v2890_v13, %s2572_s22 }
  0xef   : > { %1201 = vrot.lane.b32.xlu2 %v2890_v13, %s2573_s5  ;;  %1265 = vrot.lane.b32.xlu1 %v2890_v13, %s2574_s18 }
  0xf0   : > { %1137 = vrot.lane.b32.xlu0 %v2890_v13, %s2575_s21 }
  0xf8   : > { %1199 = vrot.lane.b32.xlu0 %v2890_v13, %s2576_s16 }
 0x141   : > { %v1264_v15 = vpop.permute.xlu2 %1263 }
 0x149   : > { %v1202_v16 = vpop.permute.xlu2 %1201 }
 0x14a   : > { %v1207_v17 = vsel %vm1078_vm2, %v1202_v16, 0 }
 0x14b   : > { %1216 = vmatpush.bf16.xpose.msrb.mxu0 %v1207_v17 }
 0x159   : > { %v1136_v18 = vpop.permute.xlu1 %1135 }
 0x15a   : > { %v1077_v19 = vpop.permute.xlu0 %1076 }
 0x15b   : > { %v1083_v20 = vsel %vm1078_vm2, %v1077_v19, 0 }
 0x15c   : > { %1092 = vmatpush.bf16.xpose.msra.mxu1 %v1083_v20 }
 0x161   : > { %v1266_v21 = vpop.permute.xlu1 %1265 }
 0x162   : > { %v1138_v22 = vpop.permute.xlu0 %1137  ;;  %v1271_v23 = vsel %vm1078_vm2, %v1266_v21, 0 }
 0x163   : > { %2234 = vmatmul.msk.bf16.vlgmr.msra.gmra.mxu1 %vm1078_vm2, %v1072_v11  ;;  %v1143_v24 = vsel %vm1078_vm2, %v1138_v22, 0 }
 0x164   : > { %1152 = vmatpush.bf16.xpose.msra.mxu3 %v1143_v24 }
 0x16a   : > { %v1200_v25 = vpop.permute.xlu0 %1199 }
 0x16b   : > { %2236 = vmatmul.msk.bf16.vlgmr.msra.gmra.mxu3 %vm1078_vm2, %v1136_v18  ;;  %2238 = vmatmul.msk.bf16.vlgmr.msrb.gmra.mxu0 %vm1078_vm2, %v1200_v25 }
 0x16c   : > { %1280 = vmatpush.bf16.xpose.msrb.mxu3 %v1271_v23 }
 0x17b   : > { %2240 = vmatmul.msk.bf16.vlgmr.msrb.gmra.mxu3 %vm1078_vm2, %v1264_v15 }
 0x1e0   : > { %v1094_v29 = vpop.f32.mrf.mxu1 }
 0x1e1   : > { %v1098_v32 = vmul.f32 0.35355338, %v1094_v29 }
 0x1e3   : > { %v1099_v33 = vadd.f32 %v1098_v32, %v1030_v31 }
 0x1e5   : > { %v1100_v34 = vsel %vm1078_vm2, %v1099_v33, -inf }
 0x1e6   : > { %1101 = vmax.xlane.f32.xlu1 %v1100_v34 }
 0x1e8   : > { %v1096_v35 = vpop.f32.mrf.mxu1  ;;  %v1218_v36 = vpop.f32.mrf.mxu0 }
 0x1e9   : > { %v1222_v41 = vmul.f32 0.35355338, %v1218_v36 }
 0x1eb   : > { %v1223_v44 = vadd.f32 %v1222_v41, %v1030_v31  ;;  %v2326_v41 = vld [vmem:[%s2809_s28 + $0x8] sm:$0xff] }
 0x1ec   : > { %1358 = vmatpush.bf16.msra.mxu0 %v2326_v41 }
 0x1ed   : > { %v1224_v45 = vsel %vm1078_vm2, %v1223_v44, -inf }
 0x1ee   : > { %v1154_v37 = vpop.f32.mrf.mxu3 }
 0x1ef   : > { %v1158_v38 = vmul.f32 0.35355338, %v1154_v37 }
 0x1f0   : > { %v1220_v39 = vpop.f32.mrf.mxu0 }
 0x1f1   : > { %v1159_v40 = vadd.f32 %v1158_v38, %v1030_v31 }
 0x1f3   : > { %v1160_v42 = vsel %vm1078_vm2, %v1159_v40, -inf }
 0x1f4   : > { %1161 = vmax.xlane.f32.xlu2 %v1160_v42  ;;  %v2325_v42 = vld [vmem:[%s2809_s28] sm:$0xff]  ;;  %s3241_s28 = sld [smem:[#allocation31_spill]] }
 0x1f5   : > { %1359 = vmatpush.bf16.msra.mxu0 %v2325_v42 }
 0x1f6   : > { %v1156_v43 = vpop.f32.mrf.mxu3 }
 0x1fa   : > { %s3242_s13 = scalar_lea.vmem %s3241_s28, %s2779_s27 }
 0x1fc   : > { %1225 = vmax.xlane.f32.xlu2 %v1224_v45 }
 0x1fe   : > { %v1282_v46 = vpop.f32.mrf.mxu3 }
 0x1ff   : > { %v1286_v47 = vmul.f32 0.35355338, %v1282_v46 }
 0x201   : > { %v1287_v48 = vadd.f32 %v1286_v47, %v1030_v31 }
 0x203   : > { %v1288_v49 = vsel %vm1078_vm2, %v1287_v48, -inf }
 0x204   : > { %1289 = vmax.xlane.f32.xlu0 %v1288_v49 }
 0x206   : > { %v1284_v50 = vpop.f32.mrf.mxu3 }
 0x214   : > { %1112 = vrot.lane.b32.xlu2 %v2890_v13, %s2578_s10  ;;  %s3238_s10 = sld [smem:[#allocation20_spill]] }
 0x21c   : > { %1300 = vrot.lane.b32.xlu2 %v2890_v13, %s2579_s0 }
 0x259   : > { %v1102_v51 = vpop.xlane.xlu1 %1101 }
 0x25a   : > { %v1103_v52 = vsub.f32 %v1099_v33, %v1102_v51 }
 0x25c   : > { %v1104_v53 = vmul.f32 1.442695, %v1103_v52 }
 0x25e   : > { %2434 = vpow2.f32 %v1104_v53 }
 0x264   : > { %v2435_v54 = vpop.eup %2434 }
 0x265   : > { %v1106_v55 = vsel %vm1078_vm2, %v2435_v54, 0.0 }
 0x266   : > { %1107 = vadd.xlane.f32.xlu1 %v1106_v55  ;;  %v2330_v55 = vld [vmem:[%s2827_s1 + $0x8] sm:$0xff] }
 0x267   : > { %v1162_v56 = vpop.xlane.xlu2 %1161  ;;  %1467 = vmatpush.bf16.msra.mxu3 %v2330_v55 }
 0x268   : > { %v1163_v59 = vsub.f32 %v1159_v40, %v1162_v56  ;;  %v2329_v56 = vld [vmem:[%s2827_s1] sm:$0xff]  ;;  %s3251_s1 = sld [smem:[#allocation41_spill]] }
 0x26a   : > { %v1164_v61 = vmul.f32 1.442695, %v1163_v59 }
 0x26b   : > { %1468 = vmatpush.bf16.msra.mxu3 %v2329_v56 }
 0x26f   : > { %v1226_v57 = vpop.xlane.xlu2 %1225 }
 0x270   : > { %v1227_v58 = vsub.f32 %v1223_v44, %v1226_v57 }
 0x272   : > { %v1228_v60 = vmul.f32 1.442695, %v1227_v58 }
 0x274   : > { %2436 = vpow2.f32 %v1228_v60 }
 0x275   : > { %2438 = vpow2.f32 %v1164_v61 }
 0x277   : > { %v1113_v62 = vpop.permute.xlu2 %1112  ;;  %v1290_v63 = vpop.xlane.xlu0 %1289 }
 0x278   : > { %v1119_v0 = vsel %vm1117_vm4, %v1113_v62, 0  ;;  %v1291_v2 = vsub.f32 %v1287_v48, %v1290_v63  ;;  %v2428_v48 = vld [vmem:[%s3236_s14] ss:$0 sm:$0xff] }
 0x279   : > { %1128 = vmatpush.bf16.msra.mxu2 %v1119_v0 }
 0x27a   : > { %v2437_v1 = vpop.eup %2436  ;;  %v1292_v4 = vmul.f32 1.442695, %v1291_v2 }
 0x27b   : > { %v1230_v3 = vsel %vm1078_vm2, %v2437_v1, 0.0  ;;  %v2439_v5 = vpop.eup %2438 }
 0x27c   : > { %1231 = vadd.xlane.f32.xlu0 %v1230_v3  ;;  %2440 = vpow2.f32 %v1292_v4  ;;  %v1166_v7 = vsel %vm1078_vm2, %v2439_v5, 0.0  ;;  %v1020_v3 = vld [vmem:[%s3237_s20] sm:$0xff] }
 0x27d   : > { %v1437_v4 = vpack.c.bf16 %v1020_v3, %v1020_v3 }
 0x27f   : > { %1172 = vrot.lane.b32.xlu1 %v2890_v13, %s2580_s26  ;;  %v1301_v16 = vpop.permute.xlu2 %1300  ;;  %2268 = vmatmul.msk.bf16.vlgmr.msra.gmra.mxu3 %vm1055_vm1, %v1437_v4  ;;  %s1926_s26 = sshll.u32 %s2872_s24, 4  ;;  %s1927_s26 = int_to_ptr.vmem [resolvable:$true] %s1926_s26 }
 0x280   : > { %v1306_v19 = vsel %vm1117_vm4, %v1301_v16, 0  ;;  %v2972_v16 = vld [vmem:[%s2865_s17] sm:$0x7]  ;;  %s3252_s17 = smov %s3251_s1 }
 0x282   : > { %v2441_v8 = vpop.eup %2440 }
 0x283   : > { %v1294_v9 = vsel %vm1078_vm2, %v2441_v8, 0.0 }
 0x284   : > { %1167 = vadd.xlane.f32.xlu0 %v1166_v7  ;;  %v2327_v7 = vld [vmem:[%s3238_s10] sm:$0xff] }
 0x28c   : > { %1295 = vadd.xlane.f32.xlu0 %v1294_v9 }
 0x2a0   : > { %1236 = vrot.lane.b32.xlu0 %v2890_v13, %s2581_s6 }
 0x2d9   : > { %v1108_v10 = vpop.xlane.xlu1 %1107 }
 0x2da   : > { %2442 = vrcp.f32 %v1108_v10 }
 0x2e0   : > { %v2443_v11 = vpop.eup %2442 }
 0x2e1   : > { %v1110_v12 = vmul.f32 %v2443_v11, %v2435_v54  ;;  %v2585_v54 = vmov 32.0  }
 0x2e3   : > { %v1111_v14 = vpack.c.bf16 %v1110_v12, %v1110_v12 }
 0x2e5   : > { %2235 = vmatmul.msk.bf16.vlgmr.msra.gmra.mxu2 %vm1078_vm2, %v1111_v14 }
 0x2ef   : > { %v1232_v15 = vpop.xlane.xlu0 %1231 }
 0x2f1   : > { %v1173_v17 = vpop.permute.xlu1 %1172 }
 0x2f2   : > { %v1178_v18 = vsel %vm1117_vm4, %v1173_v17, 0 }
 0x2f3   : > { %1187 = vmatpush.bf16.msrb.mxu2 %v1178_v18  ;;  %v2975_v18 = vld [vmem:[%s2870_s12] sm:$0x7]  ;;  %s3239_s12 = sld [smem:[#allocation33_spill]] }
 0x2f7   : > { %1315 = vmatpush.bf16.msra.mxu2 %v1306_v19  ;;  %v1168_v20 = vpop.xlane.xlu0 %1167 }
 0x2f8   : > { %2444 = vrcp.f32 %v1168_v20  ;;  %v1395_v20 = vperm.slane %v2972_v16, 0 }
 0x2f9   : > { %s3240_s0 = scalar_lea.vmem %s3239_s12, %s2779_s27 }
 0x2fe   : > { %v2445_v21 = vpop.eup %2444 }
 0x2ff   : > { %v1170_v13 = vmul.f32 %v2445_v21, %v2439_v5  ;;  %v1296_v22 = vpop.xlane.xlu0 %1295  ;;  %v2328_v5 = vld [vmem:[%s3238_s10 + $0x8] sm:$0xff]  ;;  %s3243_s10 = sld [smem:[#allocation27_spill]] }
 0x300   : > { %2446 = vrcp.f32 %v1296_v22 }
 0x301   : > { %v1171_v23 = vpack.c.bf16 %v1170_v13, %v1170_v13  ;;  %2448 = vrcp.f32 %v1232_v15  ;;  %v1397_v13 = vperm.slane %v2975_v18, 0 }
 0x302   : > { %2450 = vrcp.f32 %v2585_v54 }
 0x303   : > { %2237 = vmatmul.msk.bf16.vlgmr.msrb.gmra.mxu2 %vm1078_vm2, %v1171_v23 }
 0x306   : > { %v2447_v24 = vpop.eup %2446 }
 0x307   : > { %v1298_v25 = vmul.f32 %v2447_v24, %v2441_v8  ;;  %v2449_v26 = vpop.eup %2448 }
 0x308   : > { %v1234_v27 = vmul.f32 %v2449_v26, %v2437_v1  ;;  %v2451_v57 = vpop.eup %2450  ;;  %v2429_v26 = vld [vmem:[%s3240_s0] ss:$0 sm:$0xff] }
 0x309   : > { %v1299_v28 = vpack.c.bf16 %v1298_v25, %v1298_v25  ;;  %v1370_v58 = vmul.f32 32.0, %v2451_v57  ;;  %vm1374_vm8 = vweird.f32 %v2451_v57 }
 0x30a   : > { %v1235_v32 = vpack.c.bf16 %v1234_v27, %v1234_v27  ;;  %v1470_v27 = vpop.f32.mrf.mxu3 }
 0x30b   : > { %v1371_v59 = vsub.f32 1.0, %v1370_v58 }
 0x30d   : > { %v1372_v60 = vmul.f32 %v2451_v57, %v1371_v59 }
 0x30f   : > { %v1373_v61 = vadd.f32 %v2451_v57, %v1372_v60 }
 0x312   : > { %v1237_v29 = vpop.permute.xlu0 %1236 }
 0x313   : > { %2241 = vmatmul.msk.bf16.vlgmr.msra.gmra.mxu2 %vm1078_vm2, %v1299_v28  ;;  %v1242_v31 = vsel %vm1117_vm4, %v1237_v29, 0  ;;  %v1471_v28 = vadd.f32 %v2429_v26, %v1470_v27 }
 0x314   : > { %1251 = vmatpush.bf16.msrb.mxu1 %v1242_v31 }
 0x315   : > { %v1474_v29 = vpack.c.bf16 %v1471_v28, %v1471_v28 }
 0x317   : > { %2239 = vmatmul.msk.bf16.vlgmr.msrb.gmra.mxu1 %vm1078_vm2, %v1235_v32  ;;  %v1479_v31 = vsel %vm1078_vm2, %v1474_v29, 0  ;;  %v1512_v32 = vunpack.c.l.b16 %v1474_v29 }
 0x318   : > { %1429 = vmatpush.bf16.msra.mxu1 %v2328_v5  ;;  %1488 = vmatpush.bf16.xpose.msrb.mxu2 %v1479_v31 }
 0x31c   : > { %1430 = vmatpush.bf16.msra.mxu1 %v2327_v7 }
 0x368   : > { %v1130_v33 = vpop.f32.mrf.mxu2 }
 0x369   : > { %1134 = vst.msk [vmem:[#allocation2] sm:$0xff] %vm1078_vm2, %v1130_v33  ;;  %v2990_v33 = vpack.c.b16 %v1512_v32, %v1512_v32 }
 0x36b   : > { %1541 = vrot.lane.b32.xlu0 %v2990_v33, %s2571_s29 }
 0x370   : > { %v1132_v34 = vpop.f32.mrf.mxu2 }
 0x371   : > { %v1472_v34 = vpop.f32.mrf.mxu3 }
 0x373   : > { %1604 = vrot.lane.b32.xlu0 %v2990_v33, %s2576_s16 }
 0x386   : > { %v1189_v35 = vpop.f32.mrf.mxu2 }
 0x387   : > { %1194 = vrot.lane.b32.xlu1 %v1189_v35, %s2582_s23  ;;  %v2430_v35 = vld [vmem:[%s3242_s13] ss:$0 sm:$0xff] }
 0x38e   : > { %v1191_v36 = vpop.f32.mrf.mxu2 }
 0x394   : > { %v1253_v37 = vpop.f32.mrf.mxu1 }
 0x395   : > { %1258 = vrot.lane.b32.xlu2 %v1253_v37, %s2583_s2 }
 0x396   : > { %v1317_v38 = vpop.f32.mrf.mxu2 }
 0x397   : > { %1322 = vrot.lane.b32.xlu1 %v1317_v38, %s2584_s8 }
 0x39c   : > { %v1255_v39 = vpop.f32.mrf.mxu1 }
 0x39e   : > { %v1319_v40 = vpop.f32.mrf.mxu2 }
 0x3dd   : > { %v1542_v42 = vpop.permute.xlu0 %1541 }
 0x3ef   : > { %v1259_v44 = vpop.permute.xlu2 %1258 }
 0x3f9   : > { %v1195_v43 = vpop.permute.xlu1 %1194 }
 0x3fa   : > { %1198 = vst.msk [vmem:[#allocation2] sm:$0xff] %vm1197_vm5, %v1195_v43  ;;  %v1547_v43 = vsel %vm1078_vm2, %v1542_v42, 0 }
 0x3fb   : > { %1262 = vst.msk [vmem:[#allocation2] sm:$0xff] %vm1261_vm6, %v1259_v44  ;;  %1556 = vmatpush.bf16.xpose.msrb.mxu1 %v1547_v43  ;;  %v1605_v44 = vpop.permute.xlu0 %1604 }
 0x409   : > { %v1323_v45 = vpop.permute.xlu1 %1322 }
 0x40a   : > { %1326 = vst.msk [vmem:[#allocation2] sm:$0xff] %vm1325_vm7, %v1323_v45  ;;  %v1610_v45 = vsel %vm1078_vm2, %v1605_v44, 0 }
 0x40b   : > { %1619 = vmatpush.bf16.xpose.msra.mxu2 %v1610_v45 }
 0x411   : > { %v1327_v46 = vld [vmem:[#allocation2] sm:$0xff] }
 0x412   : > { %v1328_v47 = vpack.c.bf16 %v1327_v46, %v1327_v46 }
 0x414   : > { %2250 = vmatmul.msk.bf16.vlgmr.msra.gmra.mxu0 %vm1055_vm1, %v1328_v47 }
 0x491   : > { %v1361_v49 = vpop.f32.mrf.mxu0 }
 0x492   : > { %v1362_v50 = vadd.f32 %v2428_v48, %v1361_v49 }
 0x494   : > { %v1365_v51 = vadd.f32 %v1362_v50, %v2880_v6  ;;  %v2962_v6 = vsel %vm1374_vm8, %v2451_v57, %v1373_v61 }
 0x496   : > { %v1366_v52 = vsel %vm1055_vm1, %v1365_v51, 0.0 }
 0x497   : > { %1367 = vadd.xlane.f32.xlu2 %v1366_v52 }
 0x499   : > { %v1363_v53 = vpop.f32.mrf.mxu0 }
 0x50a   : > { %v1368_v62 = vpop.xlane.xlu2 %1367 }
 0x50b   : > { %v1376_v63 = vmul.f32 %v2962_v6, %v1368_v62 }
 0x50d   : > { %v1377_v0 = vsub.f32 %v1365_v51, %v1376_v63 }
 0x50f   : > { %v1378_v1 = vmul.f32 %v1377_v0, %v1377_v0 }
 0x511   : > { %v1379_v2 = vsel %vm1055_vm1, %v1378_v1, 0.0 }
 0x512   : > { %1380 = vadd.xlane.f32.xlu1 %v1379_v2 }
 0x585   : > { %v1381_v8 = vpop.xlane.xlu1 %1380 }
 0x586   : > { %v1382_v9 = vmul.f32 %v1381_v8, %v2962_v6 }
 0x588   : > { %v1383_v10 = vadd.f32 1e-05, %v1382_v9 }
 0x58a   : > { %2452 = vrsqrt.f32 %v1383_v10  ;;  %vm1390_vm10 = vweird.f32 %v1383_v10 }
 0x590   : > { %v2453_v11 = vpop.eup %2452 }
 0x591   : > { %v1385_v12 = vmul.f32 %v2453_v11, %v1383_v10  ;;  %vm1391_vm9 = vweird.f32 %v2453_v11 }
 0x592   : > { %vm1392_vm11 = vmor %vm1390_vm10, %vm1391_vm9 }
 0x593   : > { %v1386_v14 = vmul.f32 %v2453_v11, %v1385_v12 }
 0x595   : > { %v1387_v15 = vmul.f32 0.5, %v1386_v14 }
 0x597   : > { %v1388_v17 = vsub.f32 1.5, %v1387_v15 }
 0x599   : > { %v1389_v19 = vmul.f32 %v2453_v11, %v1388_v17 }
 0x59b   : > { %v1393_v21 = vsel %vm1392_vm11, %v2453_v11, %v1389_v19 }
 0x59c   : > { %v1394_v22 = vmul.f32 %v1393_v21, %v1377_v0 }
 0x59e   : > { %v1396_v23 = vmul.f32 %v1395_v20, %v1394_v22 }
 0x5a0   : > { %v2979_v24 = vadd.f32 %v1397_v13, %v1396_v23 }
 0x5a2   : > { %v1399_v25 = vpack.c.bf16 %v2979_v24, %v2979_v24 }
 0x5a4   : > { %2259 = vmatmul.msk.bf16.vlgmr.msra.gmra.mxu1 %vm1055_vm1, %v1399_v25 }
 0x621   : > { %v1432_v36 = vpop.f32.mrf.mxu1 }
 0x622   : > { %v1433_v37 = vadd.f32 %v2430_v35, %v1432_v36 }
 0x624   : > { %v1436_v38 = vpack.c.bf16 %v1433_v37, %v1433_v37 }
 0x626   : > { %v1537_v39 = vunpack.c.l.b16 %v1436_v38  ;;  %2269 = vmatmul.msk.bf16.vlgmr.msrb.gmra.mxu2 %vm1078_vm2, %v1436_v38 }
 0x628   : > { %v1538_v40 = vpack.c.b16 %v1537_v39, %v1537_v39 }
 0x629   : > { %v1434_v41 = vpop.f32.mrf.mxu1 }
 0x62a   : > { %1665 = vrot.lane.b32.xlu2 %v1538_v40, %s2570_s25  ;;  %1539 = vrot.lane.b32.xlu0 %v1538_v40, %s2571_s29  ;;  %s3244_s29 = scalar_lea.vmem %s3243_s10, %s2776_s3  ;;  %s3245_s3 = sld [smem:[#allocation21_spill]] }
 0x62b   : > { %v1031_v47 = vld [vmem:[%s3244_s29] sm:$0x1] }
 0x62c   : > { %vm1032_vm12 = vcmp.gt.f32.partialorder %v1031_v47, 0.0 }
 0x62d   : > { %v1033_v49 = vsel %vm1032_vm12, -1e+09, %v2577_v30 }
 0x62e   : > { %v1496_v51 = vperm.slane %v1033_v49, 0 }
 0x632   : > { %1667 = vrot.lane.b32.xlu0 %v2990_v33, %s2570_s25 }
 0x63a   : > { %1602 = vrot.lane.b32.xlu0 %v1538_v40, %s2576_s16 }
 0x684   : > { %v1666_v54 = vpop.permute.xlu2 %1665 }
 0x69c   : > { %v1540_v46 = vpop.permute.xlu0 %1539 }
 0x69d   : > { %2271 = vmatmul.msk.bf16.vlgmr.msrb.gmra.mxu1 %vm1078_vm2, %v1540_v46 }
 0x6a4   : > { %v1668_v48 = vpop.permute.xlu0 %1667 }
 0x6a5   : > { %v1673_v50 = vsel %vm1078_vm2, %v1668_v48, 0 }
 0x6a6   : > { %1682 = vmatpush.bf16.xpose.msra.mxu1 %v1673_v50 }
 0x6a9   : > { %v1490_v52 = vpop.f32.mrf.mxu2 }
 0x6aa   : > { %v1494_v53 = vmul.f32 0.35355338, %v1490_v52 }
 0x6ac   : > { %v1603_v55 = vpop.permute.xlu0 %1602  ;;  %v1498_v56 = vadd.f32 %v1496_v51, %v1494_v53 }
 0x6ad   : > { %2273 = vmatmul.msk.bf16.vlgmr.msra.gmra.mxu2 %vm1078_vm2, %v1603_v55  ;;  %2275 = vmatmul.msk.bf16.vlgmr.msra.gmra.mxu1 %vm1078_vm2, %v1666_v54 }
 0x6ae   : > { %v1499_v57 = vsel %vm1078_vm2, %v1498_v56, -inf }
 0x6af   : > { %1500 = vmax.xlane.f32.xlu0 %v1499_v57 }
 0x6b1   : > { %v1492_v58 = vpop.f32.mrf.mxu2 }
 0x6c3   : > { %1514 = vrot.lane.b32.xlu0 %v2990_v33, %s2572_s22 }
 0x6cb   : > { %1702 = vrot.lane.b32.xlu0 %v2990_v33, %s2574_s18 }
 0x71a   : > { %v1558_v30 = vpop.f32.mrf.mxu1 }
 0x71b   : > { %v1562_v59 = vmul.f32 0.35355338, %v1558_v30 }
 0x71d   : > { %v1563_v60 = vadd.f32 %v1562_v59, %v1496_v51 }
 0x71f   : > { %v1564_v61 = vsel %vm1078_vm2, %v1563_v60, -inf }
 0x720   : > { %1565 = vmax.xlane.f32.xlu1 %v1564_v61 }
 0x722   : > { %v1560_v62 = vpop.f32.mrf.mxu1  ;;  %v1501_v63 = vpop.xlane.xlu0 %1500 }
 0x723   : > { %v1502_v1 = vsub.f32 %v1498_v56, %v1501_v63 }
 0x725   : > { %v1503_v2 = vmul.f32 1.442695, %v1502_v1  ;;  %v2332_v1 = vld [vmem:[%s3245_s3 + $0x8] sm:$0xff] }
 0x726   : > { %1759 = vmatpush.bf16.msrb.mxu2 %v2332_v1 }
 0x727   : > { %2454 = vpow2.f32 %v1503_v2 }
 0x72a   : > { %v1684_v0 = vpop.f32.mrf.mxu1 }
 0x72b   : > { %v1688_v14 = vmul.f32 0.35355338, %v1684_v0 }
 0x72d   : > { %v2455_v12 = vpop.eup %2454  ;;  %v1689_v17 = vadd.f32 %v1688_v14, %v1496_v51 }
 0x72e   : > { %v1505_v15 = vsel %vm1078_vm2, %v2455_v12, 0.0 }
 0x72f   : > { %v1690_v19 = vsel %vm1078_vm2, %v1689_v17, -inf }
 0x730   : > { %v1621_v3 = vpop.f32.mrf.mxu2 }
 0x731   : > { %v1625_v4 = vmul.f32 0.35355338, %v1621_v3  ;;  %v2331_v3 = vld [vmem:[%s3245_s3] sm:$0xff]  ;;  %s2494_s3 = scalar_lea.hbm %s3252_s17, 16 }
 0x732   : > { %v1686_v5 = vpop.f32.mrf.mxu1  ;;  %1760 = vmatpush.bf16.msrb.mxu2 %v2331_v3 }
 0x733   : > { %v1626_v7 = vadd.f32 %v1625_v4, %v1496_v51 }
 0x735   : > { %v1515_v8 = vpop.permute.xlu0 %1514  ;;  %v1627_v9 = vsel %vm1078_vm2, %v1626_v7, -inf }
 0x736   : > { %v1520_v10 = vsel %vm1117_vm4, %v1515_v8, 0  ;;  %1628 = vmax.xlane.f32.xlu1 %v1627_v9 }
 0x737   : > { %1529 = vmatpush.bf16.msrb.mxu0 %v1520_v10 }
 0x738   : > { %v1623_v11 = vpop.f32.mrf.mxu2 }
 0x73d   : > { %v1703_v41 = vpop.permute.xlu0 %1702 }
 0x73e   : > { %1506 = vadd.xlane.f32.xlu1 %v1505_v15  ;;  %v1708_v44 = vsel %vm1117_vm4, %v1703_v41, 0 }
 0x746   : > { %1691 = vmax.xlane.f32.xlu1 %v1690_v19 }
 0x75f   : > { %1576 = vrot.lane.b32.xlu1 %v2990_v33, %s2575_s21 }
 0x793   : > { %v1566_v20 = vpop.xlane.xlu1 %1565 }
 0x794   : > { %v1567_v21 = vsub.f32 %v1563_v60, %v1566_v20 }
 0x796   : > { %v1568_v13 = vmul.f32 1.442695, %v1567_v21 }
 0x798   : > { %2456 = vpow2.f32 %v1568_v13 }
 0x79e   : > { %v2457_v22 = vpop.eup %2456 }
 0x79f   : > { %v1570_v23 = vsel %vm1078_vm2, %v2457_v22, 0.0 }
 0x7a0   : > { %1571 = vadd.xlane.f32.xlu2 %v1570_v23  ;;  %v2333_v23 = vld [vmem:[%s2845_s11] sm:$0xff] }
 0x7a9   : > { %v1629_v25 = vpop.xlane.xlu1 %1628 }
 0x7aa   : > { %v1630_v26 = vsub.f32 %v1626_v7, %v1629_v25  ;;  %v2338_v25 = vld [vmem:[%s2859_s30 + $0x18] sm:$0xff] }
 0x7ab   : > { %1876 = vmatpush.bf16.msrb.mxu1 %v2338_v25 }
 0x7ac   : > { %v1631_v27 = vmul.f32 1.442695, %v1630_v26 }
 0x7ae   : > { %2458 = vpow2.f32 %v1631_v27  ;;  %v2337_v27 = vld [vmem:[%s2859_s30 + $0x10] sm:$0xff] }
 0x7af   : > { %1877 = vmatpush.bf16.msrb.mxu1 %v2337_v27 }
 0x7b1   : > { %v1507_v28 = vpop.xlane.xlu1 %1506 }
 0x7b2   : > { %2460 = vrcp.f32 %v1507_v28 }
 0x7b4   : > { %v2459_v29 = vpop.eup %2458 }
 0x7b5   : > { %v1633_v31 = vsel %vm1078_vm2, %v2459_v29, 0.0 }
 0x7b6   : > { %1634 = vadd.xlane.f32.xlu2 %v1633_v31 }
 0x7b8   : > { %v2461_v32 = vpop.eup %2460 }
 0x7b9   : > { %v1509_v34 = vmul.f32 %v2461_v32, %v2455_v12  ;;  %v1692_v35 = vpop.xlane.xlu1 %1691 }
 0x7ba   : > { %v1693_v36 = vsub.f32 %v1689_v17, %v1692_v35 }
 0x7bb   : > { %v1510_v37 = vpack.c.bf16 %v1509_v34, %v1509_v34 }
 0x7bc   : > { %v1694_v38 = vmul.f32 1.442695, %v1693_v36 }
 0x7bd   : > { %2270 = vmatmul.msk.bf16.vlgmr.msrb.gmra.mxu0 %vm1078_vm2, %v1510_v37 }
 0x7be   : > { %2462 = vpow2.f32 %v1694_v38  ;;  %v1789_v38 = vperm.slane %v2972_v16, 1 }
 0x7c4   : > { %v2463_v39 = vpop.eup %2462 }
 0x7c5   : > { %v1696_v40 = vsel %vm1078_vm2, %v2463_v39, 0.0 }
 0x7c6   : > { %1697 = vadd.xlane.f32.xlu1 %v1696_v40  ;;  %v1791_v40 = vperm.slane %v2975_v18, 1 }
 0x7ce   : > { %1639 = vrot.lane.b32.xlu2 %v2990_v33, %s2573_s5  ;;  %s3246_s5 = scalar_lea.vmem %s3150_s15, %s2779_s27  ;;  %s3250_s27 = sld [smem:[#allocation7_spill]] }
 0x7cf   : > { %v2431_v9 = vld [vmem:[%s3246_s5] ss:$0 sm:$0xff] }
 0x7d1   : > { %v1577_v42 = vpop.permute.xlu1 %1576 }
 0x7d2   : > { %v1582_v43 = vsel %vm1117_vm4, %v1577_v42, 0 }
 0x7d3   : > { %1591 = vmatpush.bf16.msrb.mxu3 %v1582_v43 }
 0x7d4   : > { %s3254_s28 = sand.u32 1, %s3250_s27  }
 0x7d5   : > { %s1914_s13 = scalar_lea.sflag [#allocation4], %s3254_s28 }
 0x7d7   : > { %1717 = vmatpush.bf16.msra.mxu3 %v1708_v44 }
 0x813   : > { %v1572_v45 = vpop.xlane.xlu2 %1571 }
 0x814   : > { %2464 = vrcp.f32 %v1572_v45  ;;  %v2335_v45 = vld [vmem:[%s2859_s30] sm:$0xff] }
 0x81a   : > { %v2465_v46 = vpop.eup %2464 }
 0x81b   : > { %v1574_v47 = vmul.f32 %v2465_v46, %v2457_v22  ;;  %v2334_v22 = vld [vmem:[%s2845_s11 + $0x8] sm:$0xff]  ;;  %v2432_v46 = vld [vmem:[%s991_s19] ss:$0 sm:$0xff]  ;;  %s3249_s19 = sld [smem:[#allocation10_spill]] }
 0x81d   : > { %v1575_v48 = vpack.c.bf16 %v1574_v47, %v1574_v47 }
 0x81f   : > { %2272 = vmatmul.msk.bf16.vlgmr.msrb.gmra.mxu3 %vm1078_vm2, %v1575_v48 }
 0x829   : > { %v1635_v49 = vpop.xlane.xlu2 %1634 }
 0x82a   : > { %2466 = vrcp.f32 %v1635_v49 }
 0x830   : > { %v2467_v50 = vpop.eup %2466 }
 0x831   : > { %v1637_v51 = vmul.f32 %v2467_v50, %v2459_v29  ;;  %v1640_v33 = vpop.permute.xlu2 %1639  ;;  %v2336_v29 = vld [vmem:[%s2859_s30 + $0x8] sm:$0xff]  ;;  %s2313_s30 = sshll.u32 %s3249_s19, 3 }
 0x832   : > { %v1645_v52 = vsel %vm1117_vm4, %v1640_v33, 0  ;;  %1878 = vmatpush.bf16.msrb.mxu1 %v2336_v29  ;;  %v2433_v33 = vld [vmem:[%s999_s4] ss:$0 sm:$0xff]  ;;  %s1924_s12 = scalar_lea.hbm %s3251_s1, %s2313_s30 }
 0x833   : > { %v1638_v53 = vpack.c.bf16 %v1637_v51, %v1637_v51  ;;  %1654 = vmatpush.bf16.msra.mxu0 %v1645_v52  ;;  %s1928_s6 = sshll.u32 %s1924_s12, 4  ;;  %s1929_s6 = int_to_ptr.hbm [resolvable:$true] %s1928_s6 }
 0x834   : > { %s2488_s14 = sshra.s32 %s1929_s6, 4  ;;  %s2489_s14 = int_to_ptr.hbm [resolvable:$true] %s2488_s14 }
 0x835   : > { %s2490_s20 = scalar_lea.hbm %s2489_s14, 8  ;;  %p2495_p5 = scmp.lt.s32.totalorder %s2489_s14, %s3252_s17 }
 0x836   : > { %2274 = vmatmul.msk.bf16.vlgmr.msra.gmra.mxu0 %vm1078_vm2, %v1638_v53  ;;  %1879 = vmatpush.bf16.msrb.mxu1 %v2335_v45  ;;  %p2491_p1 = scmp.ne.s32.totalorder %s2489_s14, %s2490_s20  ;;  %p2496_p6 = scmp.lt.s32.totalorder %s2494_s3, %s2490_s20 }
 0x837   : > { %1823 = vmatpush.bf16.msrb.mxu0 %v2334_v22 }
 0x838   : > { %p2492_p2 = pnand %p2491_p1, %p2750_p3  ;;  %p2497_p7 = por %p2496_p6, %p2495_p5 }
 0x839   : > { %v1698_v54 = vpop.xlane.xlu1 %1697 }
 0x83a   : > { %2468 = vrcp.f32 %v1698_v54  ;;  %v1531_v55 = vpop.f32.mrf.mxu0  ;;  %p2493_p4 = pneg %p2492_p2 }
 0x83b   : > { %1535 = vst.msk [vmem:[#allocation2] sm:$0xff] %vm1078_vm2, %v1531_v55  ;;  %1824 = vmatpush.bf16.msrb.mxu0 %v2333_v23 }
 0x83c   : > { %p2498_p8 = pnand %p2497_p7, %p2493_p4 }
 0x840   : > { %v2469_v56 = vpop.eup %2468 }
 0x841   : > { %v1700_v57 = vmul.f32 %v2469_v56, %v2463_v39 }
 0x842   : > { %v1533_v58 = vpop.f32.mrf.mxu0 }
 0x843   : > { %v1701_v30 = vpack.c.bf16 %v1700_v57, %v1700_v57 }
 0x845   : > { %2276 = vmatmul.msk.bf16.vlgmr.msra.gmra.mxu3 %vm1078_vm2, %v1701_v30 }
 0x8a2   : > { %v1593_v59 = vpop.f32.mrf.mxu3 }
 0x8a3   : > { %1598 = vrot.lane.b32.xlu0 %v1593_v59, %s2582_s23 }
 0x8aa   : > { %v1595_v60 = vpop.f32.mrf.mxu3 }
 0x8b3   : > { %v1656_v61 = vpop.f32.mrf.mxu0 }
 0x8b4   : > { %1661 = vrot.lane.b32.xlu0 %v1656_v61, %s2583_s2 }
 0x8bb   : > { %v1658_v62 = vpop.f32.mrf.mxu0 }
 0x8c8   : > { %v1719_v63 = vpop.f32.mrf.mxu3 }
 0x8c9   : > { %1724 = vrot.lane.b32.xlu0 %v1719_v63, %s2584_s8 }
 0x8d0   : > { %v1721_v0 = vpop.f32.mrf.mxu3 }
 0x915   : > { %v1599_v2 = vpop.permute.xlu0 %1598 }
 0x916   : > { %1601 = vst.msk [vmem:[#allocation2] sm:$0xff] %vm1197_vm5, %v1599_v2 }
 0x926   : > { %v1662_v4 = vpop.permute.xlu0 %1661 }
 0x927   : > { %1664 = vst.msk [vmem:[#allocation2] sm:$0xff] %vm1261_vm6, %v1662_v4 }
 0x93b   : > { %v1725_v5 = vpop.permute.xlu0 %1724 }
 0x93c   : > { %1727 = vst.msk [vmem:[#allocation2] sm:$0xff] %vm1325_vm7, %v1725_v5 }
 0x943   : > { %v1728_v7 = vld [vmem:[#allocation2] sm:$0xff] }
 0x944   : > { %v1729_v8 = vpack.c.bf16 %v1728_v7, %v1728_v7  ;;  %v1908_v7 = vperm.slane %v2972_v16, 2 }
 0x946   : > { %2285 = vmatmul.msk.bf16.vlgmr.msrb.gmra.mxu2 %vm1055_vm1, %v1729_v8 }
 0x9c9   : > { %v1762_v10 = vpop.f32.mrf.mxu2 }
 0x9ca   : > { %v1763_v11 = vadd.f32 %v2431_v9, %v1762_v10  ;;  %v1910_v9 = vperm.slane %v2975_v18, 2 }
 0x9cc   : > { %v1766_v12 = vadd.f32 %v1763_v11, %v2979_v24 }
 0x9ce   : > { %v1767_v14 = vsel %vm1055_vm1, %v1766_v12, 0.0 }
 0x9cf   : > { %1768 = vadd.xlane.f32.xlu2 %v1767_v14 }
 0x9d1   : > { %v1764_v15 = vpop.f32.mrf.mxu2 }
 0xa42   : > { %v1769_v17 = vpop.xlane.xlu2 %1768 }
 0xa43   : > { %v1770_v19 = vmul.f32 %v1769_v17, %v2962_v6 }
 0xa45   : > { %v1771_v20 = vsub.f32 %v1766_v12, %v1770_v19 }
 0xa47   : > { %v1772_v21 = vmul.f32 %v1771_v20, %v1771_v20 }
 0xa49   : > { %v1773_v13 = vsel %vm1055_vm1, %v1772_v21, 0.0 }
 0xa4a   : > { %1774 = vadd.xlane.f32.xlu0 %v1773_v13 }
 0xabd   : > { %v1775_v24 = vpop.xlane.xlu0 %1774 }
 0xabe   : > { %v1776_v26 = vmul.f32 %v1775_v24, %v2962_v6 }
 0xac0   : > { %v1777_v28 = vadd.f32 1e-05, %v1776_v26 }
 0xac2   : > { %2470 = vrsqrt.f32 %v1777_v28  ;;  %vm1784_vm14 = vweird.f32 %v1777_v28 }
 0xac8   : > { %v2471_v31 = vpop.eup %2470 }
 0xac9   : > { %v1779_v32 = vmul.f32 %v2471_v31, %v1777_v28  ;;  %vm1785_vm13 = vweird.f32 %v2471_v31 }
 0xaca   : > { %vm1786_vm15 = vmor %vm1784_vm14, %vm1785_vm13 }
 0xacb   : > { %v1780_v34 = vmul.f32 %v2471_v31, %v1779_v32 }
 0xacd   : > { %v1781_v35 = vmul.f32 0.5, %v1780_v34 }
 0xacf   : > { %v1782_v36 = vsub.f32 1.5, %v1781_v35 }
 0xad1   : > { %v1783_v37 = vmul.f32 %v2471_v31, %v1782_v36 }
 0xad3   : > { %v1787_v39 = vsel %vm1786_vm15, %v2471_v31, %v1783_v37 }
 0xad4   : > { %v1788_v41 = vmul.f32 %v1787_v39, %v1771_v20 }
 0xad6   : > { %v1790_v42 = vmul.f32 %v1789_v38, %v1788_v41 }
 0xad8   : > { %v1792_v43 = vadd.f32 %v1791_v40, %v1790_v42 }
 0xada   : > { %v1793_v44 = vpack.c.bf16 %v1792_v43, %v1792_v43 }
 0xadc   : > { %2294 = vmatmul.msk.bf16.vlgmr.msrb.gmra.mxu0 %vm1055_vm1, %v1793_v44 }
 0xb59   : > { %v1826_v47 = vpop.f32.mrf.mxu0 }
 0xb5a   : > { %v1827_v48 = vadd.f32 %v2432_v46, %v1826_v47 }
 0xb5c   : > { %v1830_v49 = vmax.f32 %v1827_v48, 0.0 }
 0xb5e   : > { %v1831_v50 = vpack.c.bf16 %v1830_v49, %v1830_v49 }
 0xb60   : > { %2311 = vmatmul.msk.bf16.vlgmr.msrb.gmra.mxu1 %vm1868_vm0, %v1831_v50 }
 0xb61   : > { %v1828_v51 = vpop.f32.mrf.mxu0 }
 0xbdd   : > { %v1881_v52 = vpop.f32.mrf.mxu1 }
 0xbde   : > { %v1882_v53 = vadd.f32 %v2433_v33, %v1881_v52 }
 0xbe0   : > { %v1885_v54 = vadd.f32 %v1882_v53, %v1792_v43 }
 0xbe2   : > { %v1886_v55 = vsel %vm1055_vm1, %v1885_v54, 0.0 }
 0xbe3   : > { %1887 = vadd.xlane.f32.xlu1 %v1886_v55 }
 0xbe5   : > { %v1883_v56 = vpop.f32.mrf.mxu1 }
 0xc56   : > { %v1888_v57 = vpop.xlane.xlu1 %1887 }
 0xc57   : > { %v1889_v58 = vmul.f32 %v1888_v57, %v2962_v6 }
 0xc59   : > { %v1890_v30 = vsub.f32 %v1885_v54, %v1889_v58 }
 0xc5b   : > { %v1891_v59 = vmul.f32 %v1890_v30, %v1890_v30 }
 0xc5d   : > { %v1892_v60 = vsel %vm1055_vm1, %v1891_v59, 0.0 }
 0xc5e   : > { %1893 = vadd.xlane.f32.xlu1 %v1892_v60 }
 0xcd1   : > { %v1894_v61 = vpop.xlane.xlu1 %1893 }
 0xcd2   : > { %v1895_v62 = vmul.f32 %v1894_v61, %v2962_v6 }
 0xcd4   : > { %v1896_v63 = vadd.f32 1e-05, %v1895_v62 }
 0xcd6   : > { %2472 = vrsqrt.f32 %v1896_v63  ;;  %vm1903_vm3 = vweird.f32 %v1896_v63 }
 0xcdc   : > { %v2473_v0 = vpop.eup %2472 }
 0xcdd   : > { %v1898_v1 = vmul.f32 %v2473_v0, %v1896_v63  ;;  %vm1904_vm2 = vweird.f32 %v2473_v0 }
 0xcde   : > { %vm1905_vm4 = vmor %vm1903_vm3, %vm1904_vm2 }
 0xcdf   : > { %v1899_v2 = vmul.f32 %v2473_v0, %v1898_v1 }
 0xce1   : > { %v1900_v3 = vmul.f32 0.5, %v1899_v2 }
 0xce3   : > { %v1901_v4 = vsub.f32 1.5, %v1900_v3 }
 0xce5   : > { %v1902_v5 = vmul.f32 %v2473_v0, %v1901_v4 }
 0xce7   : > { %v1906_v6 = vsel %vm1905_vm4, %v2473_v0, %v1902_v5 }
 0xce8   : > { %v1907_v8 = vmul.f32 %v1906_v6, %v1890_v30 }
 0xcea   : > { %v1909_v10 = vmul.f32 %v1908_v7, %v1907_v8 }
 0xcec   : > { %v1911_v11 = vadd.f32 %v1910_v9, %v1909_v10 }
 0xcee   : > { %1912 = vst.msk [vmem:[%s2872_s24] sm:$0xff] %vm1055_vm1, %v1911_v11 }
 0xcef   : > { %2501 = shalt.err (!%p2498_p8)
}
 0xcf0   : > { %2339 = dma.vmem_to_hbm [thread:$0]  (%p2750_p3), %s1927_s26, 128, %s1929_s6, %s1914_s13  }
 0xcf1 PF: > { %s3255_s24 = sld [smem:[#allocation13_spill]] }
 0xcf2   : > { %s3256_s5 = sld [smem:[#allocation6_spill]] }
 0xcf7   : > { %p2345_p10 = scmp.ge.s32.totalorder %s3255_s24, 2 }
 0xcf8   : > { %s1940_s18 = sand.u32 1, %s3256_s5  }
 0xcf9   : > { %p2342_p11 = pnand %p2345_p10, %p2760_p9  ;;  %s1941_s21 = scalar_lea.sflag [#allocation4], %s1940_s18 }
 0xcfb   : > { %p2343_p12 = pneg %p2342_p11 }
 0xcfd   : > { %2535 = dma.done.wait (%p2343_p12), %s1941_s21, 128  }
 0xcfe   : > { %2537 = vsyncadd (%p2343_p12), %s1941_s21, 4294967168  ;;  %s35_s1 = sadd.s32 1, %s3255_s24   ;;  %s3258_s3 = sld [smem:[#allocation7_spill]] }
 0xcff   : > { %p32_p13 = scmp.ge.s32.totalorder %s35_s1, 6   ;;  %s3259_s28 = sld [smem:[#allocation8_spill]] }
 0xd00   : > { %s3260_s29 = sld [smem:[#allocation18_spill]] }
 0xd01   : > { %s3261_s30 = sld [smem:[#allocation11_spill]]  ;;  %34 = sbr.rel (!%p32_p13) target bundleno = 26 (0x1a), region = 204 }
 0xd02   : > { %s3262_s4 = sld [smem:[#allocation12_spill]] }
 0xd03   : > { %s3263_s0 = sld [smem:[#allocation14_spill]] }
 0xd04   : > { %s3264_s23 = sld [smem:[#allocation16_spill]] }
 0xd06   :  { %1947 = vsyncpa [#allocation4], 1 }
 0xd07   :  { %1949 = vsyncpa [#allocation4 + $0x1], 1 }

</bundles_post_ra>
